<compile_context>
chip_gen: v7x
topology: tpu7x:2x2x1
jax: 0.10.0
libtpu: 0.0.40
codegen_flags: <defaults>
</compile_context>

<pallas_src>
import jax
import jax.numpy as jnp
from jax import lax
from jax.experimental import pallas as pl
from jax.experimental.pallas import tpu as pltpu

LRELU_SLOPE = 0.2
BN_EPS = 1e-5

# "opt" hyper-parameters (SinGAN-style, small & deterministic)
NC_IM = 4        # opt.nc_im
NFC = 32         # opt.nfc
MIN_NFC = 8      # opt.min_nfc
KER_SIZE = 3     # opt.ker_size
PADD = 0         # opt.padd_size (SinGAN default: valid conv, -2 spatial/layer)
NUM_LAYER = 5    # opt.num_layer


def _layer_channels():
    """Channel plan exactly as in Discriminator.__init__."""
    chans = [(NC_IM, NFC)]                              # head
    n = NFC
    for i in range(NUM_LAYER - 2):                      # body
        n = int(NFC / (2 ** (i + 1)))
        chans.append((max(2 * n, MIN_NFC), max(n, MIN_NFC)))
    tail_in = max(n, MIN_NFC)                           # tail: tail_in -> 1
    return chans, tail_in


def _make_kernel(batch, h0, w0, chans, counts):
    """Builds the fused forward kernel; all shape/channel info is static."""
    m0 = batch * h0 * w0
    padw = (KER_SIZE - 1) * w0 + (KER_SIZE - 1)         # largest tap offset
    n_blocks = len(chans)

    def build_patches(xp):
        # xp: (Cin, m0 + padw) f32, zero padded along lanes.  Tap (kh, kw) of
        # the 3x3 window at flat output index p reads input p + kh*w0 + kw;
        # valid outputs never reach the pad.  Static lane-shifted slices, cast
        # once to bf16, stacked along sublanes -> (9*Cin, m0) bf16 patches.
        taps = []
        for kh in range(KER_SIZE):
            for kw in range(KER_SIZE):
                d = kh * w0 + kw
                taps.append(xp[:, d:d + m0].astype(jnp.bfloat16))
        return jnp.concatenate(taps, axis=0)

    def kernel(*refs):
        x_ref = refs[0]
        w_refs = refs[1:1 + n_blocks]
        wt_ref = refs[1 + n_blocks]
        pp_ref = refs[2 + n_blocks]
        mask_ref = refs[3 + n_blocks]
        o_ref = refs[4 + n_blocks]

        pp = pp_ref[...]        # (CMAX, 2*n_blocks+1): [g0,b0, ..., g3,b3, b_tail]
        masks = mask_ref[...]   # (n_blocks, m0) f32 {0,1} valid-output masks

        xp = x_ref[...]         # (C0, m0 + padw) f32, already zero padded
        for l in range(n_blocks):
            cout = chans[l][1]
            patches = build_patches(xp)                          # (9*Cin, m0) bf16
            acc = jnp.dot(w_refs[l][...], patches,               # (Cout, m0) f32
                          preferred_element_type=jnp.float32)
            # ConvBlock conv bias omitted: a per-channel constant is cancelled
            # exactly by the BatchNorm mean subtraction below.
            mask = masks[l:l + 1, :]                             # (1, m0)
            inv_cnt = 1.0 / counts[l]
            am = acc * mask                                      # zero stale lanes
            s = jnp.sum(am, axis=1, keepdims=True)               # (Cout, 1)
            ss = jnp.sum(am * am, axis=1, keepdims=True)
            mean = s * inv_cnt
            var = ss * inv_cnt - mean * mean                     # biased (training BN)
            gamma = pp[:cout, 2 * l:2 * l + 1]
            beta = pp[:cout, 2 * l + 1:2 * l + 2]
            scale = gamma * lax.rsqrt(var + BN_EPS)              # folded BN affine
            shift = beta - mean * scale
            y = acc * scale + shift
            y = jnp.maximum(y, LRELU_SLOPE * y)                  # LeakyReLU(0.2)
            # Re-pad along lanes for the next layer's shifted-window reads.
            xp = jnp.concatenate(
                [y, jnp.zeros((cout, padw), jnp.float32)], axis=1)

        # Tail conv: Cout == 1, keeps its bias, no BN / activation.
        # (1, K) x (K, m0) keeps the store lane-dense (no (M, 1) tensor).
        patches = build_patches(xp)
        b_tail = pp[0:1, 2 * n_blocks:2 * n_blocks + 1]
        o_ref[...] = jnp.dot(wt_ref[...], patches,
                             preferred_element_type=jnp.float32) + b_tail

    return kernel


def init_params(key):
    """Conv weight ~ N(0, 0.02); conv bias small non-zero (exercises the
    bias-cancelled-by-BN identity used in the kernel); BN gamma ~ N(1, 0.02),
    BN beta = 0 (as in Discriminator.initialize_weight)."""
    chans, tail_in = _layer_channels()
    blocks = []
    for (cin, cout) in chans:
        key, kw_, kb_, kg_ = jax.random.split(key, 4)
        w = 0.02 * jax.random.normal(kw_, (KER_SIZE, KER_SIZE, cin, cout), jnp.float32)
        b = 0.02 * jax.random.normal(kb_, (cout,), jnp.float32)
        gamma = 1.0 + 0.02 * jax.random.normal(kg_, (cout,), jnp.float32)
        beta = jnp.zeros((cout,), jnp.float32)
        blocks.append((w, b, gamma, beta))
    key, kt, kb = jax.random.split(key, 3)
    w_tail = 0.02 * jax.random.normal(kt, (KER_SIZE, KER_SIZE, tail_in, 1), jnp.float32)
    b_tail = 0.02 * jax.random.normal(kb, (1,), jnp.float32)
    return blocks, (w_tail, b_tail)


def discriminator_forward(x_nchw, block_params, tail_params):
    """x_nchw: (N, nc_im, H, W) -> (N, 1, H-10, W-10)  (PyTorch NCHW I/O)."""
    assert PADD == 0  # TODO(synk): halo padding path for padd_size > 0 configs
    chans, _ = _layer_channels()
    n_blocks = len(chans)
    batch, c0, h0, w0 = x_nchw.shape
    assert c0 == chans[0][0]
    m0 = batch * h0 * w0
    padw = (KER_SIZE - 1) * w0 + (KER_SIZE - 1)
    shrink = NUM_LAYER * (KER_SIZE - 1)
    hout, wout = h0 - shrink, w0 - shrink

    # NCHW -> (C, N*H*W): tiny channel count on sublanes, flat batch/spatial
    # index on lanes (m0 = 512 is a multiple of 128).  Zero-pad the lane axis
    # once so every 3x3 tap inside the kernel is a plain static slice.
    x2d = jnp.transpose(x_nchw, (1, 0, 2, 3)).reshape(c0, m0).astype(jnp.float32)
    x2d = jnp.pad(x2d, ((0, 0), (0, padw)))

    # Conv weights -> (Cout, KH*KW*Cin) bf16, tap-major / cin-minor, matching
    # the patch-row order built in the kernel.  ConvBlock biases intentionally
    # NOT passed (cancelled by BatchNorm).
    w_args = [jnp.transpose(w, (3, 0, 1, 2)).reshape(w.shape[3], -1)
              .astype(jnp.bfloat16) for (w, _b, _g, _be) in block_params]
    w_t, b_t = tail_params
    wt2d = jnp.transpose(w_t, (3, 0, 1, 2)).reshape(1, -1).astype(jnp.bfloat16)

    # Pack all per-channel vectors (gamma/beta per block, tail bias) into ONE
    # small (CMAX, 2*n_blocks+1) buffer -> a single tiny DMA instead of ~10.
    cmax = max(co for _ci, co in chans)
    cols = []
    for (_w, _b, g, be) in block_params:
        cols.append(jnp.pad(g.astype(jnp.float32), (0, cmax - g.shape[0])))
        cols.append(jnp.pad(be.astype(jnp.float32), (0, cmax - be.shape[0])))
    cols.append(jnp.pad(b_t.astype(jnp.float32), (0, cmax - b_t.shape[0])))
    pp = jnp.stack(cols, axis=1)

    # Per-layer valid-output masks over the fixed N*H0*W0 lane grid (the valid
    # window shrinks by 2 per valid conv); BN stats use only valid lanes.
    masks, counts = [], []
    hl, wl = h0, w0
    for _ in range(n_blocks):
        hl -= KER_SIZE - 1
        wl -= KER_SIZE - 1
        m2 = (jnp.arange(h0)[:, None] < hl) & (jnp.arange(w0)[None, :] < wl)
        masks.append(jnp.broadcast_to(m2[None], (batch, h0, w0))
                     .reshape(m0).astype(jnp.float32))
        counts.append(float(batch * hl * wl))
    masks = jnp.stack(masks, axis=0)

    kernel = _make_kernel(batch, h0, w0, chans, counts)
    vmem = pl.BlockSpec(memory_space=pltpu.MemorySpace.VMEM)
    args = [x2d] + w_args + [wt2d, pp, masks]
    out = pl.pallas_call(
        kernel,
        out_shape=jax.ShapeDtypeStruct((1, m0), jnp.float32),
        in_specs=[vmem] * len(args),
        out_specs=vmem,
        # Explicit VMEM budget (the toy working set is tiny; explicit per
        # review so larger images don't silently hit the default scoped limit).
        compiler_params=pltpu.CompilerParams(vmem_limit_bytes=32 * 1024 * 1024),
    )(*args)

    # Valid-window extraction + NCHW restore are cheap XLA slice/metadata ops.
    out = out.reshape(batch, h0, w0)[:, :hout, :wout]
    return out.reshape(batch, 1, hout, wout)


def _reference_forward(x_nchw, block_params, tail_params):
    """Pure-JAX f32 reference matching the PyTorch module (training-mode BN)."""
    dn = ('NHWC', 'HWIO', 'NHWC')
    x = jnp.transpose(x_nchw, (0, 2, 3, 1)).astype(jnp.float32)
    for (w, b, g, be) in block_params:
        y = lax.conv_general_dilated(x, w, (1, 1), 'VALID', dimension_numbers=dn,
                                     precision=lax.Precision.HIGHEST) + b
        mean = jnp.mean(y, axis=(0, 1, 2))
        var = jnp.mean((y - mean) ** 2, axis=(0, 1, 2))
        y = (y - mean) * lax.rsqrt(var + BN_EPS) * g + be
        x = jnp.where(y >= 0, y, LRELU_SLOPE * y)
    w_t, b_t = tail_params
    y = lax.conv_general_dilated(x, w_t, (1, 1), 'VALID', dimension_numbers=dn,
                                 precision=lax.Precision.HIGHEST) + b_t
    return jnp.transpose(y, (0, 3, 1, 2))


if __name__ == "__main__":
    key = jax.random.PRNGKey(0)
    key, kx, kp = jax.random.split(key, 3)

    x = jax.random.normal(kx, (2, NC_IM, 16, 16), jnp.float32)   # NCHW, like PyTorch
    blocks, tail = init_params(kp)

    fwd = jax.jit(discriminator_forward)
    out = jax.block_until_ready(fwd(x, blocks, tail))

    # padd=0, ker=3, stride=1, 5 convs total: 16 -> 14 -> 12 -> 10 -> 8 -> 6
    expected = (2, 1, 16 - 2 * NUM_LAYER, 16 - 2 * NUM_LAYER)
    assert out.shape == expected, (out.shape, expected)
    assert bool(jnp.all(jnp.isfinite(out)))

    # Correctness vs a pure-JAX f32 reference (kernel uses bf16 matmul
    # operands, hence the small tolerance).
    ref = _reference_forward(x, blocks, tail)
    err = float(jnp.max(jnp.abs(out - ref)))
    assert err < 3e-2, err
    print("KERNEL_OK")
</pallas_src>

<mosaic_0001>
module attributes {stable_mosaic.version = 11 : i64} {
  func.func @kernel(%arg0: memref<4x546xf32, #tpu.memory_space<vmem>>, %arg1: memref<32x36xbf16, #tpu.memory_space<vmem>>, %arg2: memref<16x288xbf16, #tpu.memory_space<vmem>>, %arg3: memref<8x144xbf16, #tpu.memory_space<vmem>>, %arg4: memref<8x72xbf16, #tpu.memory_space<vmem>>, %arg5: memref<1x72xbf16, #tpu.memory_space<vmem>>, %arg6: memref<32x9xf32, #tpu.memory_space<vmem>>, %arg7: memref<4x512xf32, #tpu.memory_space<vmem>>, %arg8: memref<1x512xf32, #tpu.memory_space<vmem>>) attributes {dimension_semantics = [], scalar_prefetch = 0 : i64, scratch_operands = 0 : i64, tpu.core_type = #tpu.core_type<tc>} {
    %c0 = arith.constant 0 : index
    %c0_0 = arith.constant 0 : index
    %0 = vector.load %arg6[%c0, %c0_0] : memref<32x9xf32, #tpu.memory_space<vmem>>, vector<32x9xf32>
    %c0_1 = arith.constant 0 : index
    %c0_2 = arith.constant 0 : index
    %1 = vector.load %arg7[%c0_1, %c0_2] : memref<4x512xf32, #tpu.memory_space<vmem>>, vector<4x512xf32>
    %c0_3 = arith.constant 0 : index
    %c0_4 = arith.constant 0 : index
    %2 = vector.load %arg0[%c0_3, %c0_4] : memref<4x546xf32, #tpu.memory_space<vmem>>, vector<4x546xf32>
    %3 = vector.extract_strided_slice %2 {offsets = [0, 0], sizes = [4, 512], strides = [1, 1]} : vector<4x546xf32> to vector<4x512xf32>
    %4 = arith.truncf %3 : vector<4x512xf32> to vector<4x512xbf16>
    %5 = vector.extract_strided_slice %2 {offsets = [0, 1], sizes = [4, 512], strides = [1, 1]} : vector<4x546xf32> to vector<4x512xf32>
    %6 = arith.truncf %5 : vector<4x512xf32> to vector<4x512xbf16>
    %7 = vector.extract_strided_slice %2 {offsets = [0, 2], sizes = [4, 512], strides = [1, 1]} : vector<4x546xf32> to vector<4x512xf32>
    %8 = arith.truncf %7 : vector<4x512xf32> to vector<4x512xbf16>
    %9 = vector.extract_strided_slice %2 {offsets = [0, 16], sizes = [4, 512], strides = [1, 1]} : vector<4x546xf32> to vector<4x512xf32>
    %10 = arith.truncf %9 : vector<4x512xf32> to vector<4x512xbf16>
    %11 = vector.extract_strided_slice %2 {offsets = [0, 17], sizes = [4, 512], strides = [1, 1]} : vector<4x546xf32> to vector<4x512xf32>
    %12 = arith.truncf %11 : vector<4x512xf32> to vector<4x512xbf16>
    %13 = vector.extract_strided_slice %2 {offsets = [0, 18], sizes = [4, 512], strides = [1, 1]} : vector<4x546xf32> to vector<4x512xf32>
    %14 = arith.truncf %13 : vector<4x512xf32> to vector<4x512xbf16>
    %15 = vector.extract_strided_slice %2 {offsets = [0, 32], sizes = [4, 512], strides = [1, 1]} : vector<4x546xf32> to vector<4x512xf32>
    %16 = arith.truncf %15 : vector<4x512xf32> to vector<4x512xbf16>
    %17 = vector.extract_strided_slice %2 {offsets = [0, 33], sizes = [4, 512], strides = [1, 1]} : vector<4x546xf32> to vector<4x512xf32>
    %18 = arith.truncf %17 : vector<4x512xf32> to vector<4x512xbf16>
    %19 = vector.extract_strided_slice %2 {offsets = [0, 34], sizes = [4, 512], strides = [1, 1]} : vector<4x546xf32> to vector<4x512xf32>
    %20 = arith.truncf %19 : vector<4x512xf32> to vector<4x512xbf16>
    %21 = tpu.concatenate %4, %6, %8, %10, %12, %14, %16, %18, %20 in 0 : vector<4x512xbf16>, vector<4x512xbf16>, vector<4x512xbf16>, vector<4x512xbf16>, vector<4x512xbf16>, vector<4x512xbf16>, vector<4x512xbf16>, vector<4x512xbf16>, vector<4x512xbf16> -> vector<36x512xbf16>
    %c0_5 = arith.constant 0 : index
    %c0_6 = arith.constant 0 : index
    %22 = vector.load %arg1[%c0_5, %c0_6] : memref<32x36xbf16, #tpu.memory_space<vmem>>, vector<32x36xbf16>
    %cst = arith.constant dense<0.000000e+00> : vector<32x512xf32>
    %23 = tpu.matmul %22, %21, %cst {dimension_numbers = #tpu.dot_dimension_numbers<[1], [0], [0], [1], [0, 0, 1, 1], [], []>} : vector<32x36xbf16>, vector<36x512xbf16>, vector<32x512xf32> -> vector<32x512xf32>
    %24 = vector.extract_strided_slice %1 {offsets = [0, 0], sizes = [1, 512], strides = [1, 1]} : vector<4x512xf32> to vector<1x512xf32>
    %25 = vector.broadcast %24 : vector<1x512xf32> to vector<32x512xf32>
    %26 = arith.mulf %23, %25 : vector<32x512xf32>
    %cst_7 = arith.constant dense<0.000000e+00> : vector<32xf32>
    %27 = vector.multi_reduction <add>, %26, %cst_7 [1] : vector<32x512xf32> to vector<32xf32>
    %28 = vector.shape_cast %27 : vector<32xf32> to vector<32x1xf32>
    %29 = arith.mulf %26, %26 : vector<32x512xf32>
    %cst_8 = arith.constant dense<0.000000e+00> : vector<32xf32>
    %30 = vector.multi_reduction <add>, %29, %cst_8 [1] : vector<32x512xf32> to vector<32xf32>
    %31 = vector.shape_cast %30 : vector<32xf32> to vector<32x1xf32>
    %cst_9 = arith.constant 0.00255102036 : f32
    %32 = vector.broadcast %cst_9 : f32 to vector<32x1xf32>
    %33 = arith.mulf %28, %32 : vector<32x1xf32>
    %cst_10 = arith.constant 0.00255102036 : f32
    %34 = vector.broadcast %cst_10 : f32 to vector<32x1xf32>
    %35 = arith.mulf %31, %34 : vector<32x1xf32>
    %36 = arith.mulf %33, %33 : vector<32x1xf32>
    %37 = arith.subf %35, %36 : vector<32x1xf32>
    %38 = vector.extract_strided_slice %0 {offsets = [0, 0], sizes = [32, 1], strides = [1, 1]} : vector<32x9xf32> to vector<32x1xf32>
    %39 = vector.extract_strided_slice %0 {offsets = [0, 1], sizes = [32, 1], strides = [1, 1]} : vector<32x9xf32> to vector<32x1xf32>
    %cst_11 = arith.constant 9.99999974E-6 : f32
    %40 = vector.broadcast %cst_11 : f32 to vector<32x1xf32>
    %41 = arith.addf %37, %40 : vector<32x1xf32>
    %42 = math.rsqrt %41 : vector<32x1xf32>
    %43 = arith.mulf %38, %42 : vector<32x1xf32>
    %44 = arith.mulf %33, %43 : vector<32x1xf32>
    %45 = arith.subf %39, %44 : vector<32x1xf32>
    %46 = vector.broadcast %43 : vector<32x1xf32> to vector<32x512xf32>
    %47 = arith.mulf %23, %46 : vector<32x512xf32>
    %48 = vector.broadcast %45 : vector<32x1xf32> to vector<32x512xf32>
    %49 = arith.addf %47, %48 : vector<32x512xf32>
    %cst_12 = arith.constant 2.000000e-01 : f32
    %50 = vector.broadcast %cst_12 : f32 to vector<32x512xf32>
    %51 = arith.mulf %50, %49 : vector<32x512xf32>
    %52 = arith.maximumf %49, %51 : vector<32x512xf32>
    %cst_13 = arith.constant 0.000000e+00 : f32
    %53 = vector.broadcast %cst_13 : f32 to vector<32x34xf32>
    %54 = tpu.concatenate %52, %53 in 1 : vector<32x512xf32>, vector<32x34xf32> -> vector<32x546xf32>
    %55 = vector.extract_strided_slice %54 {offsets = [0, 0], sizes = [32, 512], strides = [1, 1]} : vector<32x546xf32> to vector<32x512xf32>
    %56 = arith.truncf %55 : vector<32x512xf32> to vector<32x512xbf16>
    %57 = vector.extract_strided_slice %54 {offsets = [0, 1], sizes = [32, 512], strides = [1, 1]} : vector<32x546xf32> to vector<32x512xf32>
    %58 = arith.truncf %57 : vector<32x512xf32> to vector<32x512xbf16>
    %59 = vector.extract_strided_slice %54 {offsets = [0, 2], sizes = [32, 512], strides = [1, 1]} : vector<32x546xf32> to vector<32x512xf32>
    %60 = arith.truncf %59 : vector<32x512xf32> to vector<32x512xbf16>
    %61 = vector.extract_strided_slice %54 {offsets = [0, 16], sizes = [32, 512], strides = [1, 1]} : vector<32x546xf32> to vector<32x512xf32>
    %62 = arith.truncf %61 : vector<32x512xf32> to vector<32x512xbf16>
    %63 = vector.extract_strided_slice %54 {offsets = [0, 17], sizes = [32, 512], strides = [1, 1]} : vector<32x546xf32> to vector<32x512xf32>
    %64 = arith.truncf %63 : vector<32x512xf32> to vector<32x512xbf16>
    %65 = vector.extract_strided_slice %54 {offsets = [0, 18], sizes = [32, 512], strides = [1, 1]} : vector<32x546xf32> to vector<32x512xf32>
    %66 = arith.truncf %65 : vector<32x512xf32> to vector<32x512xbf16>
    %67 = vector.extract_strided_slice %54 {offsets = [0, 32], sizes = [32, 512], strides = [1, 1]} : vector<32x546xf32> to vector<32x512xf32>
    %68 = arith.truncf %67 : vector<32x512xf32> to vector<32x512xbf16>
    %69 = vector.extract_strided_slice %54 {offsets = [0, 33], sizes = [32, 512], strides = [1, 1]} : vector<32x546xf32> to vector<32x512xf32>
    %70 = arith.truncf %69 : vector<32x512xf32> to vector<32x512xbf16>
    %71 = vector.extract_strided_slice %54 {offsets = [0, 34], sizes = [32, 512], strides = [1, 1]} : vector<32x546xf32> to vector<32x512xf32>
    %72 = arith.truncf %71 : vector<32x512xf32> to vector<32x512xbf16>
    %73 = tpu.concatenate %56, %58, %60, %62, %64, %66, %68, %70, %72 in 0 : vector<32x512xbf16>, vector<32x512xbf16>, vector<32x512xbf16>, vector<32x512xbf16>, vector<32x512xbf16>, vector<32x512xbf16>, vector<32x512xbf16>, vector<32x512xbf16>, vector<32x512xbf16> -> vector<288x512xbf16>
    %c0_14 = arith.constant 0 : index
    %c0_15 = arith.constant 0 : index
    %74 = vector.load %arg2[%c0_14, %c0_15] : memref<16x288xbf16, #tpu.memory_space<vmem>>, vector<16x288xbf16>
    %cst_16 = arith.constant dense<0.000000e+00> : vector<16x512xf32>
    %75 = tpu.matmul %74, %73, %cst_16 {dimension_numbers = #tpu.dot_dimension_numbers<[1], [0], [0], [1], [0, 0, 1, 1], [], []>} : vector<16x288xbf16>, vector<288x512xbf16>, vector<16x512xf32> -> vector<16x512xf32>
    %76 = vector.extract_strided_slice %1 {offsets = [1, 0], sizes = [1, 512], strides = [1, 1]} : vector<4x512xf32> to vector<1x512xf32>
    %77 = vector.broadcast %76 : vector<1x512xf32> to vector<16x512xf32>
    %78 = arith.mulf %75, %77 : vector<16x512xf32>
    %cst_17 = arith.constant dense<0.000000e+00> : vector<16xf32>
    %79 = vector.multi_reduction <add>, %78, %cst_17 [1] : vector<16x512xf32> to vector<16xf32>
    %80 = vector.shape_cast %79 : vector<16xf32> to vector<16x1xf32>
    %81 = arith.mulf %78, %78 : vector<16x512xf32>
    %cst_18 = arith.constant dense<0.000000e+00> : vector<16xf32>
    %82 = vector.multi_reduction <add>, %81, %cst_18 [1] : vector<16x512xf32> to vector<16xf32>
    %83 = vector.shape_cast %82 : vector<16xf32> to vector<16x1xf32>
    %cst_19 = arith.constant 0.00347222225 : f32
    %84 = vector.broadcast %cst_19 : f32 to vector<16x1xf32>
    %85 = arith.mulf %80, %84 : vector<16x1xf32>
    %cst_20 = arith.constant 0.00347222225 : f32
    %86 = vector.broadcast %cst_20 : f32 to vector<16x1xf32>
    %87 = arith.mulf %83, %86 : vector<16x1xf32>
    %88 = arith.mulf %85, %85 : vector<16x1xf32>
    %89 = arith.subf %87, %88 : vector<16x1xf32>
    %90 = vector.extract_strided_slice %0 {offsets = [0, 2], sizes = [16, 1], strides = [1, 1]} : vector<32x9xf32> to vector<16x1xf32>
    %91 = vector.extract_strided_slice %0 {offsets = [0, 3], sizes = [16, 1], strides = [1, 1]} : vector<32x9xf32> to vector<16x1xf32>
    %cst_21 = arith.constant 9.99999974E-6 : f32
    %92 = vector.broadcast %cst_21 : f32 to vector<16x1xf32>
    %93 = arith.addf %89, %92 : vector<16x1xf32>
    %94 = math.rsqrt %93 : vector<16x1xf32>
    %95 = arith.mulf %90, %94 : vector<16x1xf32>
    %96 = arith.mulf %85, %95 : vector<16x1xf32>
    %97 = arith.subf %91, %96 : vector<16x1xf32>
    %98 = vector.broadcast %95 : vector<16x1xf32> to vector<16x512xf32>
    %99 = arith.mulf %75, %98 : vector<16x512xf32>
    %100 = vector.broadcast %97 : vector<16x1xf32> to vector<16x512xf32>
    %101 = arith.addf %99, %100 : vector<16x512xf32>
    %cst_22 = arith.constant 2.000000e-01 : f32
    %102 = vector.broadcast %cst_22 : f32 to vector<16x512xf32>
    %103 = arith.mulf %102, %101 : vector<16x512xf32>
    %104 = arith.maximumf %101, %103 : vector<16x512xf32>
    %cst_23 = arith.constant 0.000000e+00 : f32
    %105 = vector.broadcast %cst_23 : f32 to vector<16x34xf32>
    %106 = tpu.concatenate %104, %105 in 1 : vector<16x512xf32>, vector<16x34xf32> -> vector<16x546xf32>
    %107 = vector.extract_strided_slice %106 {offsets = [0, 0], sizes = [16, 512], strides = [1, 1]} : vector<16x546xf32> to vector<16x512xf32>
    %108 = arith.truncf %107 : vector<16x512xf32> to vector<16x512xbf16>
    %109 = vector.extract_strided_slice %106 {offsets = [0, 1], sizes = [16, 512], strides = [1, 1]} : vector<16x546xf32> to vector<16x512xf32>
    %110 = arith.truncf %109 : vector<16x512xf32> to vector<16x512xbf16>
    %111 = vector.extract_strided_slice %106 {offsets = [0, 2], sizes = [16, 512], strides = [1, 1]} : vector<16x546xf32> to vector<16x512xf32>
    %112 = arith.truncf %111 : vector<16x512xf32> to vector<16x512xbf16>
    %113 = vector.extract_strided_slice %106 {offsets = [0, 16], sizes = [16, 512], strides = [1, 1]} : vector<16x546xf32> to vector<16x512xf32>
    %114 = arith.truncf %113 : vector<16x512xf32> to vector<16x512xbf16>
    %115 = vector.extract_strided_slice %106 {offsets = [0, 17], sizes = [16, 512], strides = [1, 1]} : vector<16x546xf32> to vector<16x512xf32>
    %116 = arith.truncf %115 : vector<16x512xf32> to vector<16x512xbf16>
    %117 = vector.extract_strided_slice %106 {offsets = [0, 18], sizes = [16, 512], strides = [1, 1]} : vector<16x546xf32> to vector<16x512xf32>
    %118 = arith.truncf %117 : vector<16x512xf32> to vector<16x512xbf16>
    %119 = vector.extract_strided_slice %106 {offsets = [0, 32], sizes = [16, 512], strides = [1, 1]} : vector<16x546xf32> to vector<16x512xf32>
    %120 = arith.truncf %119 : vector<16x512xf32> to vector<16x512xbf16>
    %121 = vector.extract_strided_slice %106 {offsets = [0, 33], sizes = [16, 512], strides = [1, 1]} : vector<16x546xf32> to vector<16x512xf32>
    %122 = arith.truncf %121 : vector<16x512xf32> to vector<16x512xbf16>
    %123 = vector.extract_strided_slice %106 {offsets = [0, 34], sizes = [16, 512], strides = [1, 1]} : vector<16x546xf32> to vector<16x512xf32>
    %124 = arith.truncf %123 : vector<16x512xf32> to vector<16x512xbf16>
    %125 = tpu.concatenate %108, %110, %112, %114, %116, %118, %120, %122, %124 in 0 : vector<16x512xbf16>, vector<16x512xbf16>, vector<16x512xbf16>, vector<16x512xbf16>, vector<16x512xbf16>, vector<16x512xbf16>, vector<16x512xbf16>, vector<16x512xbf16>, vector<16x512xbf16> -> vector<144x512xbf16>
    %c0_24 = arith.constant 0 : index
    %c0_25 = arith.constant 0 : index
    %126 = vector.load %arg3[%c0_24, %c0_25] : memref<8x144xbf16, #tpu.memory_space<vmem>>, vector<8x144xbf16>
    %cst_26 = arith.constant dense<0.000000e+00> : vector<8x512xf32>
    %127 = tpu.matmul %126, %125, %cst_26 {dimension_numbers = #tpu.dot_dimension_numbers<[1], [0], [0], [1], [0, 0, 1, 1], [], []>} : vector<8x144xbf16>, vector<144x512xbf16>, vector<8x512xf32> -> vector<8x512xf32>
    %128 = vector.extract_strided_slice %1 {offsets = [2, 0], sizes = [1, 512], strides = [1, 1]} : vector<4x512xf32> to vector<1x512xf32>
    %129 = vector.broadcast %128 : vector<1x512xf32> to vector<8x512xf32>
    %130 = arith.mulf %127, %129 : vector<8x512xf32>
    %cst_27 = arith.constant dense<0.000000e+00> : vector<8xf32>
    %131 = vector.multi_reduction <add>, %130, %cst_27 [1] : vector<8x512xf32> to vector<8xf32>
    %132 = vector.shape_cast %131 : vector<8xf32> to vector<8x1xf32>
    %133 = arith.mulf %130, %130 : vector<8x512xf32>
    %cst_28 = arith.constant dense<0.000000e+00> : vector<8xf32>
    %134 = vector.multi_reduction <add>, %133, %cst_28 [1] : vector<8x512xf32> to vector<8xf32>
    %135 = vector.shape_cast %134 : vector<8xf32> to vector<8x1xf32>
    %cst_29 = arith.constant 5.000000e-03 : f32
    %136 = vector.broadcast %cst_29 : f32 to vector<8x1xf32>
    %137 = arith.mulf %132, %136 : vector<8x1xf32>
    %cst_30 = arith.constant 5.000000e-03 : f32
    %138 = vector.broadcast %cst_30 : f32 to vector<8x1xf32>
    %139 = arith.mulf %135, %138 : vector<8x1xf32>
    %140 = arith.mulf %137, %137 : vector<8x1xf32>
    %141 = arith.subf %139, %140 : vector<8x1xf32>
    %142 = vector.extract_strided_slice %0 {offsets = [0, 4], sizes = [8, 1], strides = [1, 1]} : vector<32x9xf32> to vector<8x1xf32>
    %143 = vector.extract_strided_slice %0 {offsets = [0, 5], sizes = [8, 1], strides = [1, 1]} : vector<32x9xf32> to vector<8x1xf32>
    %cst_31 = arith.constant 9.99999974E-6 : f32
    %144 = vector.broadcast %cst_31 : f32 to vector<8x1xf32>
    %145 = arith.addf %141, %144 : vector<8x1xf32>
    %146 = math.rsqrt %145 : vector<8x1xf32>
    %147 = arith.mulf %142, %146 : vector<8x1xf32>
    %148 = arith.mulf %137, %147 : vector<8x1xf32>
    %149 = arith.subf %143, %148 : vector<8x1xf32>
    %150 = vector.broadcast %147 : vector<8x1xf32> to vector<8x512xf32>
    %151 = arith.mulf %127, %150 : vector<8x512xf32>
    %152 = vector.broadcast %149 : vector<8x1xf32> to vector<8x512xf32>
    %153 = arith.addf %151, %152 : vector<8x512xf32>
    %cst_32 = arith.constant 2.000000e-01 : f32
    %154 = vector.broadcast %cst_32 : f32 to vector<8x512xf32>
    %155 = arith.mulf %154, %153 : vector<8x512xf32>
    %156 = arith.maximumf %153, %155 : vector<8x512xf32>
    %cst_33 = arith.constant 0.000000e+00 : f32
    %157 = vector.broadcast %cst_33 : f32 to vector<8x34xf32>
    %158 = tpu.concatenate %156, %157 in 1 : vector<8x512xf32>, vector<8x34xf32> -> vector<8x546xf32>
    %159 = vector.extract_strided_slice %158 {offsets = [0, 0], sizes = [8, 512], strides = [1, 1]} : vector<8x546xf32> to vector<8x512xf32>
    %160 = arith.truncf %159 : vector<8x512xf32> to vector<8x512xbf16>
    %161 = vector.extract_strided_slice %158 {offsets = [0, 1], sizes = [8, 512], strides = [1, 1]} : vector<8x546xf32> to vector<8x512xf32>
    %162 = arith.truncf %161 : vector<8x512xf32> to vector<8x512xbf16>
    %163 = vector.extract_strided_slice %158 {offsets = [0, 2], sizes = [8, 512], strides = [1, 1]} : vector<8x546xf32> to vector<8x512xf32>
    %164 = arith.truncf %163 : vector<8x512xf32> to vector<8x512xbf16>
    %165 = vector.extract_strided_slice %158 {offsets = [0, 16], sizes = [8, 512], strides = [1, 1]} : vector<8x546xf32> to vector<8x512xf32>
    %166 = arith.truncf %165 : vector<8x512xf32> to vector<8x512xbf16>
    %167 = vector.extract_strided_slice %158 {offsets = [0, 17], sizes = [8, 512], strides = [1, 1]} : vector<8x546xf32> to vector<8x512xf32>
    %168 = arith.truncf %167 : vector<8x512xf32> to vector<8x512xbf16>
    %169 = vector.extract_strided_slice %158 {offsets = [0, 18], sizes = [8, 512], strides = [1, 1]} : vector<8x546xf32> to vector<8x512xf32>
    %170 = arith.truncf %169 : vector<8x512xf32> to vector<8x512xbf16>
    %171 = vector.extract_strided_slice %158 {offsets = [0, 32], sizes = [8, 512], strides = [1, 1]} : vector<8x546xf32> to vector<8x512xf32>
    %172 = arith.truncf %171 : vector<8x512xf32> to vector<8x512xbf16>
    %173 = vector.extract_strided_slice %158 {offsets = [0, 33], sizes = [8, 512], strides = [1, 1]} : vector<8x546xf32> to vector<8x512xf32>
    %174 = arith.truncf %173 : vector<8x512xf32> to vector<8x512xbf16>
    %175 = vector.extract_strided_slice %158 {offsets = [0, 34], sizes = [8, 512], strides = [1, 1]} : vector<8x546xf32> to vector<8x512xf32>
    %176 = arith.truncf %175 : vector<8x512xf32> to vector<8x512xbf16>
    %177 = tpu.concatenate %160, %162, %164, %166, %168, %170, %172, %174, %176 in 0 : vector<8x512xbf16>, vector<8x512xbf16>, vector<8x512xbf16>, vector<8x512xbf16>, vector<8x512xbf16>, vector<8x512xbf16>, vector<8x512xbf16>, vector<8x512xbf16>, vector<8x512xbf16> -> vector<72x512xbf16>
    %c0_34 = arith.constant 0 : index
    %c0_35 = arith.constant 0 : index
    %178 = vector.load %arg4[%c0_34, %c0_35] : memref<8x72xbf16, #tpu.memory_space<vmem>>, vector<8x72xbf16>
    %cst_36 = arith.constant dense<0.000000e+00> : vector<8x512xf32>
    %179 = tpu.matmul %178, %177, %cst_36 {dimension_numbers = #tpu.dot_dimension_numbers<[1], [0], [0], [1], [0, 0, 1, 1], [], []>} : vector<8x72xbf16>, vector<72x512xbf16>, vector<8x512xf32> -> vector<8x512xf32>
    %180 = vector.extract_strided_slice %1 {offsets = [3, 0], sizes = [1, 512], strides = [1, 1]} : vector<4x512xf32> to vector<1x512xf32>
    %181 = vector.broadcast %180 : vector<1x512xf32> to vector<8x512xf32>
    %182 = arith.mulf %179, %181 : vector<8x512xf32>
    %cst_37 = arith.constant dense<0.000000e+00> : vector<8xf32>
    %183 = vector.multi_reduction <add>, %182, %cst_37 [1] : vector<8x512xf32> to vector<8xf32>
    %184 = vector.shape_cast %183 : vector<8xf32> to vector<8x1xf32>
    %185 = arith.mulf %182, %182 : vector<8x512xf32>
    %cst_38 = arith.constant dense<0.000000e+00> : vector<8xf32>
    %186 = vector.multi_reduction <add>, %185, %cst_38 [1] : vector<8x512xf32> to vector<8xf32>
    %187 = vector.shape_cast %186 : vector<8xf32> to vector<8x1xf32>
    %cst_39 = arith.constant 7.812500e-03 : f32
    %188 = vector.broadcast %cst_39 : f32 to vector<8x1xf32>
    %189 = arith.mulf %184, %188 : vector<8x1xf32>
    %cst_40 = arith.constant 7.812500e-03 : f32
    %190 = vector.broadcast %cst_40 : f32 to vector<8x1xf32>
    %191 = arith.mulf %187, %190 : vector<8x1xf32>
    %192 = arith.mulf %189, %189 : vector<8x1xf32>
    %193 = arith.subf %191, %192 : vector<8x1xf32>
    %194 = vector.extract_strided_slice %0 {offsets = [0, 6], sizes = [8, 1], strides = [1, 1]} : vector<32x9xf32> to vector<8x1xf32>
    %195 = vector.extract_strided_slice %0 {offsets = [0, 7], sizes = [8, 1], strides = [1, 1]} : vector<32x9xf32> to vector<8x1xf32>
    %cst_41 = arith.constant 9.99999974E-6 : f32
    %196 = vector.broadcast %cst_41 : f32 to vector<8x1xf32>
    %197 = arith.addf %193, %196 : vector<8x1xf32>
    %198 = math.rsqrt %197 : vector<8x1xf32>
    %199 = arith.mulf %194, %198 : vector<8x1xf32>
    %200 = arith.mulf %189, %199 : vector<8x1xf32>
    %201 = arith.subf %195, %200 : vector<8x1xf32>
    %202 = vector.broadcast %199 : vector<8x1xf32> to vector<8x512xf32>
    %203 = arith.mulf %179, %202 : vector<8x512xf32>
    %204 = vector.broadcast %201 : vector<8x1xf32> to vector<8x512xf32>
    %205 = arith.addf %203, %204 : vector<8x512xf32>
    %cst_42 = arith.constant 2.000000e-01 : f32
    %206 = vector.broadcast %cst_42 : f32 to vector<8x512xf32>
    %207 = arith.mulf %206, %205 : vector<8x512xf32>
    %208 = arith.maximumf %205, %207 : vector<8x512xf32>
    %cst_43 = arith.constant 0.000000e+00 : f32
    %209 = vector.broadcast %cst_43 : f32 to vector<8x34xf32>
    %210 = tpu.concatenate %208, %209 in 1 : vector<8x512xf32>, vector<8x34xf32> -> vector<8x546xf32>
    %211 = vector.extract_strided_slice %210 {offsets = [0, 0], sizes = [8, 512], strides = [1, 1]} : vector<8x546xf32> to vector<8x512xf32>
    %212 = arith.truncf %211 : vector<8x512xf32> to vector<8x512xbf16>
    %213 = vector.extract_strided_slice %210 {offsets = [0, 1], sizes = [8, 512], strides = [1, 1]} : vector<8x546xf32> to vector<8x512xf32>
    %214 = arith.truncf %213 : vector<8x512xf32> to vector<8x512xbf16>
    %215 = vector.extract_strided_slice %210 {offsets = [0, 2], sizes = [8, 512], strides = [1, 1]} : vector<8x546xf32> to vector<8x512xf32>
    %216 = arith.truncf %215 : vector<8x512xf32> to vector<8x512xbf16>
    %217 = vector.extract_strided_slice %210 {offsets = [0, 16], sizes = [8, 512], strides = [1, 1]} : vector<8x546xf32> to vector<8x512xf32>
    %218 = arith.truncf %217 : vector<8x512xf32> to vector<8x512xbf16>
    %219 = vector.extract_strided_slice %210 {offsets = [0, 17], sizes = [8, 512], strides = [1, 1]} : vector<8x546xf32> to vector<8x512xf32>
    %220 = arith.truncf %219 : vector<8x512xf32> to vector<8x512xbf16>
    %221 = vector.extract_strided_slice %210 {offsets = [0, 18], sizes = [8, 512], strides = [1, 1]} : vector<8x546xf32> to vector<8x512xf32>
    %222 = arith.truncf %221 : vector<8x512xf32> to vector<8x512xbf16>
    %223 = vector.extract_strided_slice %210 {offsets = [0, 32], sizes = [8, 512], strides = [1, 1]} : vector<8x546xf32> to vector<8x512xf32>
    %224 = arith.truncf %223 : vector<8x512xf32> to vector<8x512xbf16>
    %225 = vector.extract_strided_slice %210 {offsets = [0, 33], sizes = [8, 512], strides = [1, 1]} : vector<8x546xf32> to vector<8x512xf32>
    %226 = arith.truncf %225 : vector<8x512xf32> to vector<8x512xbf16>
    %227 = vector.extract_strided_slice %210 {offsets = [0, 34], sizes = [8, 512], strides = [1, 1]} : vector<8x546xf32> to vector<8x512xf32>
    %228 = arith.truncf %227 : vector<8x512xf32> to vector<8x512xbf16>
    %229 = tpu.concatenate %212, %214, %216, %218, %220, %222, %224, %226, %228 in 0 : vector<8x512xbf16>, vector<8x512xbf16>, vector<8x512xbf16>, vector<8x512xbf16>, vector<8x512xbf16>, vector<8x512xbf16>, vector<8x512xbf16>, vector<8x512xbf16>, vector<8x512xbf16> -> vector<72x512xbf16>
    %230 = vector.extract_strided_slice %0 {offsets = [0, 8], sizes = [1, 1], strides = [1, 1]} : vector<32x9xf32> to vector<1x1xf32>
    %c0_44 = arith.constant 0 : index
    %c0_45 = arith.constant 0 : index
    %231 = vector.load %arg5[%c0_44, %c0_45] : memref<1x72xbf16, #tpu.memory_space<vmem>>, vector<1x72xbf16>
    %cst_46 = arith.constant dense<0.000000e+00> : vector<1x512xf32>
    %232 = tpu.matmul %231, %229, %cst_46 {dimension_numbers = #tpu.dot_dimension_numbers<[1], [0], [0], [1], [0, 0, 1, 1], [], []>} : vector<1x72xbf16>, vector<72x512xbf16>, vector<1x512xf32> -> vector<1x512xf32>
    %233 = vector.broadcast %230 : vector<1x1xf32> to vector<1x512xf32>
    %234 = arith.addf %232, %233 : vector<1x512xf32>
    %c0_47 = arith.constant 0 : index
    %c0_48 = arith.constant 0 : index
    %235 = vector.load %arg8[%c0_47, %c0_48] : memref<1x512xf32, #tpu.memory_space<vmem>>, vector<1x512xf32>
    tpu.vector_store %arg8[%c0_47, %c0_48], %234 {strides = array<i32>} : memref<1x512xf32, #tpu.memory_space<vmem>>, vector<1x512xf32>,
    return
  }
}

</mosaic_0001>

<bundles_post_ra>
// kernel: discriminator_forward.1
= control target key start
LH: loop header
LB: loop body
LE: loop exit
PB: predicated region body
PF: predicated region fallthrough
CT: control target
= control target key end

     0   :  { %s2399_s9 = smov 127   ;;  %s2400_s10 = smov 126   ;;  %v2406_v25 = vmov 0   ;;  %vm70_vm0 = vcmask 1039360   ;;  %vm90_vm1 = vcmask 1031168   ;;  %vm190_vm2 = vcmask 1041408   ;;  %s3507_s0 = inlined_call_operand.vmem [shape: f32[4,546], index: 0, kind: input, shape index: {}]   ;;  %s3508_s1 = inlined_call_operand.vmem [shape: bf16[32,36], index: 1, kind: input, shape index: {}]   ;;  %s3509_s7 = inlined_call_operand.vmem [shape: f32[4,512], index: 7, kind: input, shape index: {}]   ;;  %s3510_s6 = inlined_call_operand.vmem [shape: f32[32,9], index: 6, kind: input, shape index: {}]   ;;  %s3511_s2 = inlined_call_operand.vmem [shape: bf16[16,288], index: 2, kind: input, shape index: {}]   ;;  %s3512_s3 = inlined_call_operand.vmem [shape: bf16[8,144], index: 3, kind: input, shape index: {}]   ;;  %s3513_s4 = inlined_call_operand.vmem [shape: bf16[8,72], index: 4, kind: input, shape index: {}]   ;;  %s3514_s5 = inlined_call_operand.vmem [shape: bf16[1,72], index: 5, kind: input, shape index: {}]   ;;  %s3515_s8 = inlined_call_operand.vmem [shape: f32[1,512], index: 8, kind: output, shape index: {}]  }
   0x1   :  { %v37_v0 = vld [vmem:[%s3507_s0 + $0x8] sm:$0xff]  ;;  %v36_v1 = vld [vmem:[%s3507_s0] sm:$0xff]  ;;  %v38_v13 = vld [vmem:[%s3507_s0 + $0x10] sm:$0xf]  ;;  %s2401_s13 = smov 112   ;;  %s2402_s0 = smov 111   ;;  %322 = vmatprep.mubr.bf16.mxu0 %v2406_v25  ;;  %375 = vmatprep.mubr.bf16.mxu1 %v2406_v25 }
   0x2   :  { %v2470_v2 = vpack.c.bf16 %v37_v0, %v37_v0  ;;  %v2472_v3 = vpack.c.bf16 %v36_v1, %v36_v1  ;;  %v41_v4 = vcombine.high %v36_v1, %v36_v1  ;;  %v42_v10 = vcombine.high %v37_v0, %v37_v0  ;;  %s2403_s14 = smov 110   ;;  %s2404_s15 = smov 96   ;;  %2358 = vset.pattern.permute.xlu0 %v2406_v25 }
   0x3   :  { %v49_v16 = vpack.c.bf16 %v38_v13, %v38_v13  ;;  %s2405_s16 = smov 95   ;;  %2359 = vset.pattern.permute.xlu1 %v2406_v25  ;;  %s2407_s17 = smov 94   ;;  %vm110_vm3 = vcmask 916480   ;;  %vm203_vm4 = vcmask 1043456   ;;  %vm212_vm5 = vcmask 1045504  }
   0x4   :  { %v57_v5 = vrot.slane %v2470_v2, 6  ;;  %v55_v6 = vrot.slane %v2472_v3, 6  ;;  %v77_v7 = vrot.slane %v2470_v2, 4  ;;  %v75_v8 = vrot.slane %v2472_v3, 4  ;;  %s2408_s29 = smov 1  }
   0x5   :  { %v2480_v9 = vpack.c.bf16 %v41_v4, %v41_v4  ;;  %v97_v14 = vrot.slane %v2470_v2, 2  ;;  %v2493_v17 = vpack.c.bf16 %v42_v10, %v42_v10  ;;  %v59_v18 = vrot.slane %v49_v16, 6 }
   0x6   :  { %64 = vrot.lane.b32.xlu0 %v57_v5, %s2399_s9  ;;  %60 = vrot.lane.b32.xlu1 %v55_v6, %s2399_s9  ;;  %v95_v21 = vrot.slane %v2472_v3, 2  ;;  %v79_v22 = vrot.slane %v49_v16, 4  ;;  %v99_v24 = vrot.slane %v49_v16, 2  ;;  %vm140_vm6 = vcmask 900096  }
   0x7   :  { %v76_v11 = vrot.slane %v2480_v9, 4  ;;  %v56_v12 = vrot.slane %v2480_v9, 6  ;;  %v96_v15 = vrot.slane %v2480_v9, 2  ;;  %v58_v19 = vrot.slane %v2493_v17, 6 }
   0x8   :  { %v78_v20 = vrot.slane %v2493_v17, 4  ;;  %v98_v23 = vrot.slane %v2493_v17, 2  ;;  %vm155_vm7 = vcmask 785408   ;;  %vm125_vm8 = vcmask 908288  }
   0x9   :  { %vm170_vm9 = vcmask 777216   ;;  %vm185_vm10 = vcmask 769024   ;;  %vm271_vm11 = vcmask 293888   ;;  %vm971_vm12 = vcmask 261120  }
   0xa   :  { %84 = vrot.lane.b32.xlu0 %v77_v7, %s2400_s10  ;;  %80 = vrot.lane.b32.xlu1 %v75_v8, %s2400_s10  ;;  %vm1440_vm13 = vcmask 130048   ;;  %vm1801_vm14 = vcmask 588800  }
   0xe   :  { %82 = vrot.lane.b32.xlu1 %v76_v11, %s2400_s10  ;;  %62 = vrot.lane.b32.xlu0 %v56_v12, %s2399_s9 }
  0x12   :  { %104 = vrot.lane.b32.xlu1 %v97_v14, %s2401_s13  ;;  %102 = vrot.lane.b32.xlu0 %v96_v15, %s2401_s13 }
  0x16   :  { %68 = vrot.lane.b32.xlu1 %v59_v18, %s2399_s9  ;;  %66 = vrot.lane.b32.xlu0 %v58_v19, %s2399_s9 }
  0x1a   :  { %86 = vrot.lane.b32.xlu1 %v78_v20, %s2400_s10  ;;  %100 = vrot.lane.b32.xlu0 %v95_v21, %s2401_s13 }
  0x1e   :  { %117 = vrot.lane.b32.xlu1 %v2480_v9, %s2402_s0  ;;  %88 = vrot.lane.b32.xlu0 %v79_v22, %s2400_s10 }
  0x22   :  { %132 = vrot.lane.b32.xlu1 %v56_v12, %s2403_s14  ;;  %119 = vrot.lane.b32.xlu0 %v2470_v2, %s2402_s0 }
  0x26   :  { %106 = vrot.lane.b32.xlu1 %v98_v23, %s2401_s13  ;;  %134 = vrot.lane.b32.xlu0 %v57_v5, %s2403_s14 }
  0x2a   :  { %115 = vrot.lane.b32.xlu1 %v2472_v3, %s2402_s0  ;;  %108 = vrot.lane.b32.xlu0 %v99_v24, %s2401_s13 }
  0x2e   :  { %147 = vrot.lane.b32.xlu1 %v76_v11, %s2404_s15  ;;  %130 = vrot.lane.b32.xlu0 %v55_v6, %s2403_s14 }
  0x32   :  { %145 = vrot.lane.b32.xlu1 %v75_v8, %s2404_s15  ;;  %149 = vrot.lane.b32.xlu0 %v77_v7, %s2404_s15 }
  0x36   :  { %164 = vrot.lane.b32.xlu1 %v97_v14, %s2405_s16  ;;  %162 = vrot.lane.b32.xlu0 %v96_v15, %s2405_s16 }
  0x3a   :  { %123 = vrot.lane.b32.xlu1 %v49_v16, %s2402_s0  ;;  %121 = vrot.lane.b32.xlu0 %v2493_v17, %s2402_s0 }
  0x3e   :  { %138 = vrot.lane.b32.xlu1 %v59_v18, %s2403_s14  ;;  %136 = vrot.lane.b32.xlu0 %v58_v19, %s2403_s14 }
  0x42   :  { %151 = vrot.lane.b32.xlu1 %v78_v20, %s2404_s15  ;;  %160 = vrot.lane.b32.xlu0 %v95_v21, %s2405_s16 }
  0x46   :  { %166 = vrot.lane.b32.xlu1 %v98_v23, %s2405_s16  ;;  %153 = vrot.lane.b32.xlu0 %v79_v22, %s2404_s15 }
  0x4a   :  { %175 = vrot.lane.b32.xlu1 %v2472_v3, %s2407_s17  ;;  %168 = vrot.lane.b32.xlu0 %v99_v24, %s2405_s16 }
  0x4e   :  { %179 = vrot.lane.b32.xlu1 %v2470_v2, %s2407_s17  ;;  %177 = vrot.lane.b32.xlu0 %v2480_v9, %s2407_s17 }
  0x52   :  { %183 = vrot.lane.b32.xlu1 %v49_v16, %s2407_s17  ;;  %181 = vrot.lane.b32.xlu0 %v2493_v17, %s2407_s17 }
  0x78   :  { %v65_v26 = vpop.permute.xlu0 %64  ;;  %v61_v27 = vpop.permute.xlu1 %60 }
  0x7c   :  { %v85_v28 = vpop.permute.xlu0 %84  ;;  %v81_v29 = vpop.permute.xlu1 %80 }
  0x80   :  { %v83_v30 = vpop.permute.xlu1 %82  ;;  %v63_v31 = vpop.permute.xlu0 %62 }
  0x81   :  { %v72_v32 = vsel %vm70_vm0, %v63_v31, %v65_v26  ;;  %v92_v33 = vsel %vm90_vm1, %v83_v30, %v85_v28  ;;  %v71_v40 = vsel %vm70_vm0, %v61_v27, %v63_v31  ;;  %v91_v43 = vsel %vm90_vm1, %v81_v29, %v83_v30 }
  0x82   :  { %v196_v34 = vsel %vm190_vm2, %v2480_v9, %v72_v32  ;;  %v193_v44 = vsel %vm190_vm2, %v2472_v3, %v71_v40 }
  0x83   :  { %v207_v38 = vsel %vm203_vm4, %v196_v34, %v92_v33  ;;  %v205_v48 = vsel %vm203_vm4, %v193_v44, %v91_v43 }
  0x84   :  { %v105_v35 = vpop.permute.xlu1 %104  ;;  %v103_v36 = vpop.permute.xlu0 %102 }
  0x85   :  { %v112_v37 = vsel %vm110_vm3, %v103_v36, %v105_v35 }
  0x86   :  { %v217_v39 = vsel %vm212_vm5, %v207_v38, %v112_v37 }
  0x87   :  { %290 = vmatprep.subr.bf16.mxu0 %v217_v39 }
  0x88   :  { %v69_v41 = vpop.permute.xlu1 %68  ;;  %v67_v42 = vpop.permute.xlu0 %66 }
  0x89   :  { %v74_v56 = vsel %vm70_vm0, %v67_v42, %v69_v41  ;;  %v73_v57 = vsel %vm70_vm0, %v65_v26, %v67_v42 }
  0x8a   :  { %v202_v62 = vsel %vm190_vm2, %v2493_v17, %v74_v56  ;;  %v199_v3 = vsel %vm190_vm2, %v2470_v2, %v73_v57  ;;  %v2372_v56 = vld [vmem:[%s3508_s1] sm:$0xff]  }
  0x8c   :  { %v87_v45 = vpop.permute.xlu1 %86  ;;  %v101_v46 = vpop.permute.xlu0 %100 }
  0x8d   :  { %v111_v47 = vsel %vm110_vm3, %v101_v46, %v103_v36  ;;  %v93_v59 = vsel %vm90_vm1, %v85_v28, %v87_v45 }
  0x8e   :  { %v214_v49 = vsel %vm212_vm5, %v205_v48, %v111_v47  ;;  %v209_v5 = vsel %vm203_vm4, %v199_v3, %v93_v59  ;;  %v34_v3 = vld [vmem:[%s3509_s7] sm:$0xff] }
  0x8f   :  { %291 = vmatpush1.bf16.msra.mxu0 %v214_v49 }
  0x90   :  { %v118_v50 = vpop.permute.xlu1 %117  ;;  %v89_v51 = vpop.permute.xlu0 %88 }
  0x91   :  { %v94_v58 = vsel %vm90_vm1, %v87_v45, %v89_v51 }
  0x92   :  { %v211_v1 = vsel %vm203_vm4, %v202_v62, %v94_v58  ;;  %v2373_v62 = vld [vmem:[%s3508_s1 + $0x8] sm:$0xff]  }
  0x94   :  { %v133_v52 = vpop.permute.xlu1 %132  ;;  %v120_v53 = vpop.permute.xlu0 %119 }
  0x95   :  { %v127_v2 = vsel %vm125_vm8, %v118_v50, %v120_v53 }
  0x98   :  { %v107_v54 = vpop.permute.xlu1 %106  ;;  %v135_v55 = vpop.permute.xlu0 %134 }
  0x99   :  { %v113_v63 = vsel %vm110_vm3, %v105_v35, %v107_v54  ;;  %v142_v11 = vsel %vm140_vm6, %v133_v52, %v135_v55 }
  0x9a   :  { %v220_v6 = vsel %vm212_vm5, %v209_v5, %v113_v63  ;;  %v230_v13 = vsel %vm190_vm2, %v127_v2, %v142_v11  ;;  %v398_v63 = vlaneseq }
  0x9c   :  { %v116_v60 = vpop.permute.xlu1 %115  ;;  %v109_v61 = vpop.permute.xlu0 %108  ;;  %vm2298_vm15 = vcmp.lt.s32.totalorder %v398_v63, 512 }
  0x9d   :  { %v114_v0 = vsel %vm110_vm3, %v107_v54, %v109_v61  ;;  %v126_v26 = vsel %vm125_vm8, %v116_v60, %v118_v50 }
  0x9e   :  { %v223_v4 = vsel %vm212_vm5, %v211_v1, %v114_v0  ;;  %v2618_v0 = vshrl.u32 %v398_v63, 7 }
  0x9f   :  { %343 = vmatprep.subr.bf16.mxu1 %v223_v4 }
  0xa0   :  { %v148_v7 = vpop.permute.xlu1 %147  ;;  %344 = vmatpush1.bf16.msra.mxu1 %v220_v6  ;;  %v131_v8 = vpop.permute.xlu0 %130  ;;  %v400_v1 = vsub.s32 0, %v2618_v0  ;;  %v404_v4 = vsub.s32 4, %v2618_v0 }
  0xa1   :  { %v141_v23 = vsel %vm140_vm6, %v131_v8, %v133_v52 }
  0xa2   :  { %v227_v27 = vsel %vm190_vm2, %v126_v26, %v141_v23  ;;  %v401_v5 = vrot.slane %v34_v3, %v400_v1  ;;  %v405_v6 = vrot.slane %v34_v3, %v404_v4 }
  0xa4   :  { %v146_v9 = vpop.permute.xlu1 %145  ;;  %v150_v10 = vpop.permute.xlu0 %149  ;;  %v421_v8 = vrot.slane %v401_v5, %v400_v1 }
  0xa5   :  { %v157_v12 = vsel %vm155_vm7, %v148_v7, %v150_v10  ;;  %v156_v24 = vsel %vm155_vm7, %v146_v9, %v148_v7  ;;  %v35_v7 = vld [vmem:[%s3509_s7 + $0x8] sm:$0xff] }
  0xa6   :  { %v240_v17 = vsel %vm203_vm4, %v230_v13, %v157_v12  ;;  %v238_v31 = vsel %vm203_vm4, %v227_v27, %v156_v24  ;;  %v409_v9 = vrot.slane %v35_v7, %v400_v1  ;;  %v413_v11 = vrot.slane %v35_v7, %v404_v4 }
  0xa8   :  { %v165_v14 = vpop.permute.xlu1 %164  ;;  %v163_v15 = vpop.permute.xlu0 %162 }
  0xa9   :  { %v172_v16 = vsel %vm170_vm9, %v163_v15, %v165_v14 }
  0xaa   :  { %v249_v18 = vsel %vm212_vm5, %v240_v17, %v172_v16  ;;  %v433_v17 = vrot.slane %v413_v11, %v400_v1 }
  0xab   :  { %292 = vmatprep.subr.bf16.mxu0 %v249_v18 }
  0xac   :  { %v124_v19 = vpop.permute.xlu1 %123  ;;  %v122_v20 = vpop.permute.xlu0 %121 }
  0xad   :  { %v129_v38 = vsel %vm125_vm8, %v122_v20, %v124_v19  ;;  %v128_v40 = vsel %vm125_vm8, %v120_v53, %v122_v20 }
  0xb0   :  { %v139_v21 = vpop.permute.xlu1 %138  ;;  %v137_v22 = vpop.permute.xlu0 %136 }
  0xb1   :  { %v144_v35 = vsel %vm140_vm6, %v137_v22, %v139_v21  ;;  %v143_v36 = vsel %vm140_vm6, %v135_v55, %v137_v22 }
  0xb2   :  { %v236_v41 = vsel %vm190_vm2, %v129_v38, %v144_v35  ;;  %v233_v45 = vsel %vm190_vm2, %v128_v40, %v143_v36 }
  0xb4   :  { %v152_v28 = vpop.permute.xlu1 %151  ;;  %v161_v29 = vpop.permute.xlu0 %160 }
  0xb5   :  { %v171_v30 = vsel %vm170_vm9, %v161_v29, %v163_v15  ;;  %v158_v39 = vsel %vm155_vm7, %v150_v10, %v152_v28  ;;  %v425_v10 = vrot.slane %v405_v6, %v400_v1 }
  0xb6   :  { %v246_v32 = vsel %vm212_vm5, %v238_v31, %v171_v30  ;;  %v242_v49 = vsel %vm203_vm4, %v233_v45, %v158_v39 }
  0xb7   :  { %293 = vmatpush1.bf16.msra.mxu0 %v246_v32 }
  0xb8   :  { %v167_v33 = vpop.permute.xlu1 %166  ;;  %v154_v34 = vpop.permute.xlu0 %153 }
  0xb9   :  { %v159_v37 = vsel %vm155_vm7, %v152_v28, %v154_v34  ;;  %v173_v42 = vsel %vm170_vm9, %v165_v14, %v167_v33  ;;  %v429_v14 = vrot.slane %v409_v9, %v400_v1 }
  0xba   :  { %v244_v47 = vsel %vm203_vm4, %v236_v41, %v159_v37  ;;  %v252_v50 = vsel %vm212_vm5, %v242_v49, %v173_v42 }
  0xbc   :  { %v176_v43 = vpop.permute.xlu1 %175  ;;  %v169_v44 = vpop.permute.xlu0 %168 }
  0xbd   :  { %v174_v46 = vsel %vm170_vm9, %v167_v33, %v169_v44 }
  0xbe   :  { %v255_v48 = vsel %vm212_vm5, %v244_v47, %v174_v46 }
  0xbf   :  { %345 = vmatprep.subr.bf16.mxu1 %v255_v48 }
  0xc0   :  { %v180_v51 = vpop.permute.xlu1 %179  ;;  %346 = vmatpush1.bf16.msra.mxu1 %v252_v50  ;;  %v178_v52 = vpop.permute.xlu0 %177 }
  0xc1   :  { %v187_v53 = vsel %vm185_vm10, %v178_v52, %v180_v51  ;;  %v186_v54 = vsel %vm185_vm10, %v176_v43, %v178_v52 }
  0xc2   :  { %2307 = vmatprep.subr.msk.bf16.mxu0 %vm190_vm2, %v187_v53  ;;  %v279_v55 = vsel %vm190_vm2, %v186_v54, 0 }
  0xc3   :  { %295 = vmatpush1.bf16.msra.mxu0 %v279_v55 }
  0xc4   :  { %v184_v57 = vpop.permute.xlu1 %183  ;;  %v182_v58 = vpop.permute.xlu0 %181 }
  0xc5   :  { %v189_v59 = vsel %vm185_vm10, %v182_v58, %v184_v57  ;;  %v188_v60 = vsel %vm185_vm10, %v180_v51, %v182_v58 }
  0xc6   :  { %2308 = vmatmul.mubr.msk.bf16.vlgmr.msra.gmra.mrb[0].mxu0 %vm271_vm11, %v2372_v56  ;;  %2310 = vmatprep.subr.msk.bf16.mxu1 %vm190_vm2, %v189_v59  ;;  %v285_v61 = vsel %vm190_vm2, %v188_v60, 0 }
  0xc7   :  { %348 = vmatpush1.bf16.msra.mxu1 %v285_v61  ;;  %332 = vmatprep.mubr.bf16.mxu0 %v2406_v25 }
  0xca   :  { %2311 = vmatmul.mubr.msk.bf16.vlgmr.msra.gmra.mrb[0].mxu1 %vm271_vm11, %v2372_v56 }
  0xcb   :  { %385 = vmatprep.mubr.bf16.mxu1 %v2406_v25 }
  0xce   :  { %2309 = vmatmul.mubr.msk.bf16.gmra.mrb[4].mxu0 %vm271_vm11, %v2373_v62 }
  0xd2   :  { %2312 = vmatmul.mubr.msk.bf16.gmra.mrb[4].mxu1 %vm271_vm11, %v2373_v62 }
 0x199   :  { %v2628_v12 = vpop.f32.mrb[0].mxu0 }
 0x19a   :  { %v434_v2 = vmul.f32 %v421_v8, %v2628_v12  ;;  %v2631_v13 = vpop.f32.mrb[1].mxu0 }
 0x19b   :  { %v435_v15 = vmul.f32 %v425_v10, %v2631_v13  ;;  %v2634_v16 = vpop.f32.mrb[2].mxu0 }
 0x19c   :  { %v470_v18 = vmul.f32 %v434_v2, %v434_v2  ;;  %v438_v19 = vmul.f32 %v421_v8, %v2634_v16  ;;  %v2637_v20 = vpop.f32.mrb[3].mxu0 }
 0x19d   :  { %v450_v21 = vadd.f32 %v435_v15, %v434_v2  ;;  %v471_v22 = vmul.f32 %v435_v15, %v435_v15  ;;  %v439_v23 = vmul.f32 %v425_v10, %v2637_v20  ;;  %v2640_v24 = vpop.f32.mrb[0].mxu1 }
 0x19e   :  { %v474_v26 = vmul.f32 %v438_v19, %v438_v19  ;;  %v436_v27 = vmul.f32 %v429_v14, %v2640_v24  ;;  %v2643_v28 = vpop.f32.mrb[1].mxu1 }
 0x19f   :  { %v455_v29 = vadd.f32 %v439_v23, %v438_v19  ;;  %v475_v30 = vmul.f32 %v439_v23, %v439_v23  ;;  %v437_v31 = vmul.f32 %v433_v17, %v2643_v28  ;;  %v2646_v32 = vpop.f32.mrb[2].mxu1  ;;  %v486_v33 = vadd.f32 %v471_v22, %v470_v18 }
 0x1a0   :  { %v472_v34 = vmul.f32 %v436_v27, %v436_v27  ;;  %v440_v35 = vmul.f32 %v429_v14, %v2646_v32  ;;  %v2649_v36 = vpop.f32.mrb[3].mxu1  ;;  %v451_v37 = vadd.f32 %v450_v21, %v436_v27 }
 0x1a1   :  { %v441_v38 = vmul.f32 %v433_v17, %v2649_v36  ;;  %v2652_v39 = vpop.f32.mrb[4].mxu0  ;;  %v473_v40 = vmul.f32 %v437_v31, %v437_v31  ;;  %v491_v41 = vadd.f32 %v475_v30, %v474_v26 }
 0x1a2   :  { %v476_v42 = vmul.f32 %v440_v35, %v440_v35  ;;  %v442_v43 = vmul.f32 %v421_v8, %v2652_v39  ;;  %v2655_v44 = vpop.f32.mrb[5].mxu0  ;;  %v452_v45 = vadd.f32 %v451_v37, %v437_v31  ;;  %v456_v46 = vadd.f32 %v455_v29, %v440_v35 }
 0x1a3   :  { %v443_v47 = vmul.f32 %v425_v10, %v2655_v44  ;;  %v2658_v48 = vpop.f32.mrb[6].mxu0  ;;  %v487_v49 = vadd.f32 %v486_v33, %v472_v34  ;;  %v477_v50 = vmul.f32 %v441_v38, %v441_v38 }
 0x1a4   :  { %v478_v51 = vmul.f32 %v442_v43, %v442_v43  ;;  %453 = vadd.xlane.f32.xlu0 %v452_v45  ;;  %v446_v52 = vmul.f32 %v421_v8, %v2658_v48  ;;  %v457_v53 = vadd.f32 %v456_v46, %v441_v38  ;;  %v2661_v54 = vpop.f32.mrb[7].mxu0  ;;  %v492_v55 = vadd.f32 %v491_v41, %v476_v42 }
 0x1a5   :  { %v460_v56 = vadd.f32 %v443_v47, %v442_v43  ;;  %v479_v57 = vmul.f32 %v443_v47, %v443_v47  ;;  %v2663_v58 = vpop.f32.mrb[4].mxu1  ;;  %v447_v59 = vmul.f32 %v425_v10, %v2661_v54  ;;  %v488_v60 = vadd.f32 %v487_v49, %v473_v40 }
 0x1a6   :  { %v444_v61 = vmul.f32 %v429_v14, %v2663_v58  ;;  %v482_v62 = vmul.f32 %v446_v52, %v446_v52  ;;  %458 = vadd.xlane.f32.xlu1 %v457_v53  ;;  %v2667_v1 = vpop.f32.mrb[5].mxu1  ;;  %v493_v3 = vadd.f32 %v492_v55, %v477_v50 }
 0x1a7   :  { %v465_v4 = vadd.f32 %v447_v59, %v446_v52  ;;  %v483_v5 = vmul.f32 %v447_v59, %v447_v59  ;;  %v445_v6 = vmul.f32 %v433_v17, %v2667_v1  ;;  %v2670_v7 = vpop.f32.mrb[6].mxu1  ;;  %v496_v8 = vadd.f32 %v479_v57, %v478_v51 }
 0x1a8   :  { %v480_v9 = vmul.f32 %v444_v61, %v444_v61  ;;  %489 = vadd.xlane.f32.xlu0 %v488_v60  ;;  %v448_v11 = vmul.f32 %v429_v14, %v2670_v7  ;;  %v2673_v10 = vpop.f32.mrb[7].mxu1  ;;  %v461_v2 = vadd.f32 %v460_v56, %v444_v61 }
 0x1a9   :  { %v449_v15 = vmul.f32 %v433_v17, %v2673_v10  ;;  %v481_v18 = vmul.f32 %v445_v6, %v445_v6  ;;  %v501_v19 = vadd.f32 %v483_v5, %v482_v62  ;;  %v2679_v5 = vld [vmem:[%s3510_s6] sm:$0xff] }
 0x1aa   :  { %v484_v21 = vmul.f32 %v448_v11, %v448_v11  ;;  %v462_v22 = vadd.f32 %v461_v2, %v445_v6  ;;  %v497_v23 = vadd.f32 %v496_v8, %v480_v9  ;;  %v466_v26 = vadd.f32 %v465_v4, %v448_v11  ;;  %v2685_v11 = vld [vmem:[%s3510_s6 + $0x8] sm:$0xff] }
 0x1ab   :  { %v485_v27 = vmul.f32 %v449_v15, %v449_v15 }
 0x1ac   :  { %494 = vadd.xlane.f32.xlu0 %v493_v3  ;;  %463 = vadd.xlane.f32.xlu1 %v462_v22  ;;  %v498_v29 = vadd.f32 %v497_v23, %v481_v18  ;;  %v467_v30 = vadd.f32 %v466_v26, %v449_v15  ;;  %v502_v31 = vadd.f32 %v501_v19, %v484_v21  ;;  %v32_v19 = vld [vmem:[%s3510_s6 + $0x10] sm:$0xff]  ;;  %v33_v26 = vld [vmem:[%s3510_s6 + $0x18] sm:$0xff] }
 0x1ae   :  { %v503_v33 = vadd.f32 %v502_v31, %v485_v27 }
 0x1b0   :  { %499 = vadd.xlane.f32.xlu1 %v498_v29  ;;  %468 = vadd.xlane.f32.xlu0 %v467_v30 }
 0x1b4   :  { %504 = vadd.xlane.f32.xlu0 %v503_v33  ;;  %v2409_v33 = vmov 0.0|0.0  }
 0x231   :  { %v454_v14 = vpop.xlane.xlu0 %453 }
 0x232   :  { %v506_v34 = vmul.f32 0.0025510204, %v454_v14  ;;  %v2410_v14 = vmov 1  }
 0x233   :  { %v459_v35 = vpop.xlane.xlu1 %458 }
 0x234   :  { %v514_v37 = vmul.f32 %v506_v34, %v506_v34  ;;  %v507_v38 = vmul.f32 0.0025510204, %v459_v35 }
 0x235   :  { %v490_v17 = vpop.xlane.xlu0 %489 }
 0x236   :  { %v510_v40 = vmul.f32 0.0025510204, %v490_v17  ;;  %v515_v45 = vmul.f32 %v507_v38, %v507_v38 }
 0x238   :  { %v518_v41 = vsub.f32 %v510_v40, %v514_v37 }
 0x239   :  { %v495_v42 = vpop.xlane.xlu0 %494  ;;  %v464_v43 = vpop.xlane.xlu1 %463 }
 0x23a   :  { %v522_v46 = vadd.f32 1e-05, %v518_v41  ;;  %v511_v47 = vmul.f32 0.0025510204, %v495_v42  ;;  %v508_v49 = vmul.f32 0.0025510204, %v464_v43 }
 0x23c   :  { %2380 = vrsqrt.f32 %v522_v46  ;;  %v519_v50 = vsub.f32 %v511_v47, %v515_v45  ;;  %v516_v51 = vmul.f32 %v508_v49, %v508_v49 }
 0x23d   :  { %v500_v52 = vpop.xlane.xlu1 %499  ;;  %v469_v53 = vpop.xlane.xlu0 %468 }
 0x23e   :  { %v523_v55 = vadd.f32 1e-05, %v519_v50  ;;  %v512_v56 = vmul.f32 0.0025510204, %v500_v52  ;;  %v509_v57 = vmul.f32 0.0025510204, %v469_v53 }
 0x240   :  { %2382 = vrsqrt.f32 %v523_v55  ;;  %v520_v59 = vsub.f32 %v512_v56, %v516_v51  ;;  %v517_v60 = vmul.f32 %v509_v57, %v509_v57 }
 0x241   :  { %v505_v61 = vpop.xlane.xlu0 %504 }
 0x242   :  { %v524_v62 = vadd.f32 1e-05, %v520_v59  ;;  %v513_v3 = vmul.f32 0.0025510204, %v505_v61 }
 0x244   :  { %2384 = vrsqrt.f32 %v524_v62  ;;  %v521_v4 = vsub.f32 %v513_v3, %v517_v60 }
 0x246   :  { %v2381_v6 = vpop.eup %2380  ;;  %v525_v8 = vadd.f32 1e-05, %v521_v4 }
 0x247   :  { %v530_v9 = vmul.f32 %v2381_v6, %v2679_v5 }
 0x248   :  { %2386 = vrsqrt.f32 %v525_v8 }
 0x249   :  { %v534_v2 = vmul.f32 %v530_v9, %v506_v34 }
 0x24a   :  { %v2383_v15 = vpop.eup %2382 }
 0x24b   :  { %542 = vrot.lane.b32.xlu1 %v534_v2, %s2408_s29  ;;  %v531_v18 = vmul.f32 %v2383_v15, %v2685_v11 }
 0x24d   :  { %v535_v21 = vmul.f32 %v531_v18, %v507_v38 }
 0x24e   :  { %v2385_v22 = vpop.eup %2384 }
 0x24f   :  { %544 = vrot.lane.b32.xlu0 %v535_v21, %s2408_s29  ;;  %v532_v23 = vmul.f32 %v2385_v22, %v32_v19 }
 0x251   :  { %v536_v27 = vmul.f32 %v532_v23, %v508_v49 }
 0x252   :  { %v2387_v29 = vpop.eup %2386 }
 0x253   :  { %546 = vrot.lane.b32.xlu1 %v536_v27, %s2408_s29  ;;  %560 = vperm.xlu0 %2358, %v530_v9   ;;  %v533_v30 = vmul.f32 %v2387_v29, %v33_v26 }
 0x255   :  { %v537_v31 = vmul.f32 %v533_v30, %v509_v57 }
 0x257   :  { %548 = vrot.lane.b32.xlu1 %v537_v31, %s2408_s29  ;;  %688 = vrot.lane.b32.xlu0 %v2409_v33, %s2399_s9 }
 0x258   :  { %2361 = vset.pattern.permute.xlu0 %v2410_v14 }
 0x25b   :  { %565 = vperm.xlu1 %2359, %v531_v18   ;;  %756 = vrot.lane.b32.xlu0 %v2409_v33, %s2401_s13 }
 0x25f   :  { %570 = vperm.xlu1 %2359, %v532_v23   ;;  %824 = vrot.lane.b32.xlu0 %v2409_v33, %s2403_s14 }
 0x263   :  { %575 = vperm.xlu1 %2359, %v533_v30  }
 0x267   :  { %722 = vrot.lane.b32.xlu1 %v2409_v33, %s2400_s10 }
 0x268   :  { %2360 = vset.pattern.permute.xlu1 %v2410_v14 }
 0x26b   :  { %790 = vrot.lane.b32.xlu1 %v2409_v33, %s2402_s0 }
 0x2bd   :  { %v543_v34 = vpop.permute.xlu1 %542 }
 0x2be   :  { %v554_v35 = vsub.f32 %v2679_v5, %v543_v34 }
 0x2c0   :  { %596 = vperm.xlu1 %2360, %v554_v35  }
 0x2c1   :  { %v545_v17 = vpop.permute.xlu0 %544 }
 0x2c2   :  { %v555_v37 = vsub.f32 %v2685_v11, %v545_v17 }
 0x2c4   :  { %601 = vperm.xlu0 %2361, %v555_v37  }
 0x2c5   :  { %v547_v38 = vpop.permute.xlu1 %546 }
 0x2c6   :  { %v556_v40 = vsub.f32 %v32_v19, %v547_v38 }
 0x2c8   :  { %606 = vperm.xlu0 %2361, %v556_v40  }
 0x2c9   :  { %v549_v41 = vpop.permute.xlu1 %548 }
 0x2ca   :  { %v557_v42 = vsub.f32 %v33_v26, %v549_v41 }
 0x2cc   :  { %611 = vperm.xlu1 %2360, %v557_v42   ;;  %892 = vrot.lane.b32.xlu0 %v2409_v33, %s2405_s16 }
 0x2d0   :  { %858 = vrot.lane.b32.xlu1 %v2409_v33, %s2404_s15 }
 0x2d2   :  { %v561_v46 = vpop.permute.xlu0 %560 }
 0x2d3   :  { %v578_v53 = vmul.f32 %v561_v46, %v2628_v12  ;;  %v579_v55 = vmul.f32 %v561_v46, %v2631_v13  ;;  %v580_v56 = vmul.f32 %v561_v46, %v2640_v24  ;;  %v581_v57 = vmul.f32 %v561_v46, %v2643_v28 }
 0x2d6   :  { %v2714_v49 = vpop.permute.xlu0 %688 }
 0x2da   :  { %v566_v43 = vpop.permute.xlu1 %565  ;;  %v2718_v51 = vpop.permute.xlu0 %756 }
 0x2db   :  { %v582_v6 = vmul.f32 %v566_v43, %v2634_v16  ;;  %v583_v12 = vmul.f32 %v566_v43, %v2637_v20  ;;  %v584_v13 = vmul.f32 %v566_v43, %v2646_v32  ;;  %v585_v24 = vmul.f32 %v566_v43, %v2649_v36 }
 0x2de   :  { %v571_v45 = vpop.permute.xlu1 %570  ;;  %v2726_v59 = vpop.permute.xlu0 %824 }
 0x2df   :  { %v586_v18 = vmul.f32 %v571_v45, %v2652_v39  ;;  %v587_v19 = vmul.f32 %v571_v45, %v2655_v44  ;;  %v588_v21 = vmul.f32 %v571_v45, %v2663_v58  ;;  %v589_v16 = vmul.f32 %v571_v45, %v2667_v1 }
 0x2e2   :  { %v576_v47 = vpop.permute.xlu1 %575 }
 0x2e3   :  { %v590_v41 = vmul.f32 %v576_v47, %v2658_v48  ;;  %v591_v42 = vmul.f32 %v576_v47, %v2661_v54  ;;  %v592_v43 = vmul.f32 %v576_v47, %v2670_v7  ;;  %v593_v46 = vmul.f32 %v576_v47, %v2673_v10 }
 0x2e6   :  { %v2716_v50 = vpop.permute.xlu1 %722 }
 0x2ea   :  { %v2720_v52 = vpop.permute.xlu1 %790 }
 0x33f   :  { %v597_v60 = vpop.permute.xlu1 %596 }
 0x340   :  { %v614_v61 = vadd.f32 %v597_v60, %v578_v53  ;;  %v615_v62 = vadd.f32 %v597_v60, %v579_v55  ;;  %v616_v3 = vadd.f32 %v597_v60, %v580_v56  ;;  %v617_v4 = vadd.f32 %v597_v60, %v581_v57 }
 0x342   :  { %v630_v8 = vmul.f32 0.2, %v614_v61  ;;  %v631_v9 = vmul.f32 0.2, %v615_v62  ;;  %v632_v2 = vmul.f32 0.2, %v616_v3 }
 0x343   :  { %v633_v15 = vmul.f32 0.2, %v617_v4  ;;  %v602_v28 = vpop.permute.xlu0 %601 }
 0x344   :  { %v618_v22 = vadd.f32 %v602_v28, %v582_v6  ;;  %v619_v23 = vadd.f32 %v602_v28, %v583_v12  ;;  %v620_v26 = vadd.f32 %v602_v28, %v584_v13  ;;  %v621_v27 = vadd.f32 %v602_v28, %v585_v24 }
 0x345   :  { %v646_v29 = vmax.f32 %v614_v61, %v630_v8  ;;  %v647_v20 = vmax.f32 %v615_v62, %v631_v9  ;;  %v648_v30 = vmax.f32 %v616_v3, %v632_v2  ;;  %v649_v31 = vmax.f32 %v617_v4, %v633_v15 }
 0x346   :  { %v634_v32 = vmul.f32 0.2, %v618_v22  ;;  %v635_v36 = vmul.f32 0.2, %v619_v23  ;;  %v636_v14 = vmul.f32 0.2, %v620_v26 }
 0x347   :  { %v637_v34 = vmul.f32 0.2, %v621_v27  ;;  %v607_v35 = vpop.permute.xlu0 %606 }
 0x348   :  { %v650_v39 = vmax.f32 %v618_v22, %v634_v32  ;;  %v622_v17 = vadd.f32 %v607_v35, %v586_v18  ;;  %v623_v44 = vadd.f32 %v607_v35, %v587_v19  ;;  %v624_v37 = vadd.f32 %v607_v35, %v588_v21 }
 0x349   :  { %v651_v58 = vmax.f32 %v619_v23, %v635_v36  ;;  %v652_v38 = vmax.f32 %v620_v26, %v636_v14  ;;  %v653_v40 = vmax.f32 %v621_v27, %v637_v34  ;;  %v625_v1 = vadd.f32 %v607_v35, %v589_v16  ;;  %v2376_v23 = vld [vmem:[%s3511_s2 + $0x4] ss:$12 sps:$4 sm:$0xff]  }
 0x34a   :  { %v2739_v45 = vpack.c.bf16 %v650_v39, %v646_v29  ;;  %v638_v60 = vmul.f32 0.2, %v622_v17  ;;  %v639_v61 = vmul.f32 0.2, %v623_v44  ;;  %v640_v62 = vmul.f32 0.2, %v624_v37  ;;  %1007 = vmatprep.mubr.bf16.mxu0 %v2376_v23  ;;  %1093 = vmatprep.mubr.bf16.mxu1 %v2376_v23 }
 0x34b   :  { %v2742_v53 = vpack.c.bf16 %v651_v58, %v647_v20  ;;  %v2744_v55 = vpack.c.bf16 %v652_v38, %v648_v30  ;;  %v2746_v56 = vpack.c.bf16 %v653_v40, %v649_v31  ;;  %v612_v57 = vpop.permute.xlu1 %611  ;;  %v641_v48 = vmul.f32 0.2, %v625_v1  ;;  %v2881_v27 = vpop.permute.xlu0 %892 }
 0x34c   :  { %v626_v3 = vadd.f32 %v612_v57, %v590_v41  ;;  %v627_v4 = vadd.f32 %v612_v57, %v591_v42  ;;  %v628_v54 = vadd.f32 %v612_v57, %v592_v43  ;;  %v629_v6 = vadd.f32 %v612_v57, %v593_v46 }
 0x34d   :  { %1061 = vmatprep.subr.bf16.mxu1 %v2746_v56  ;;  %684 = vrot.lane.b32.xlu1 %v2744_v55, %s2399_s9  ;;  %v654_v9 = vmax.f32 %v622_v17, %v638_v60  ;;  %v655_v2 = vmax.f32 %v623_v44, %v639_v61  ;;  %v656_v12 = vmax.f32 %v624_v37, %v640_v62 }
 0x34e   :  { %v642_v7 = vmul.f32 0.2, %v626_v3  ;;  %682 = vrot.lane.b32.xlu0 %v2742_v53, %s2399_s9  ;;  %v643_v10 = vmul.f32 0.2, %v627_v4  ;;  %v644_v47 = vmul.f32 0.2, %v628_v54  ;;  %975 = vmatprep.subr.bf16.mxu0 %v2742_v53  ;;  %v657_v24 = vmax.f32 %v625_v1, %v641_v48 }
 0x34f   :  { %v645_v8 = vmul.f32 0.2, %v629_v6  ;;  %1062 = vmatpush1.bf16.msra.mxu1 %v2744_v55  ;;  %976 = vmatpush1.bf16.msra.mxu0 %v2739_v45  ;;  %v2879_v26 = vpop.permute.xlu1 %858 }
 0x350   :  { %v658_v13 = vmax.f32 %v626_v3, %v642_v7  ;;  %v659_v15 = vmax.f32 %v627_v4, %v643_v10  ;;  %v660_v28 = vmax.f32 %v628_v54, %v644_v47 }
 0x351   :  { %v661_v18 = vmax.f32 %v629_v6, %v645_v8  ;;  %686 = vrot.lane.b32.xlu1 %v2746_v56, %s2399_s9 }
 0x352   :  { %v2756_v19 = vpack.c.bf16 %v658_v13, %v654_v9  ;;  %680 = vrot.lane.b32.xlu0 %v2739_v45, %s2399_s9  ;;  %v2762_v21 = vpack.c.bf16 %v659_v15, %v655_v2  ;;  %v2764_v22 = vpack.c.bf16 %v660_v28, %v656_v12 }
 0x353   :  { %v2766_v16 = vpack.c.bf16 %v661_v18, %v657_v24 }
 0x354   :  { %977 = vmatprep.subr.bf16.mxu0 %v2762_v21 }
 0x355   :  { %1063 = vmatprep.subr.bf16.mxu1 %v2766_v16  ;;  %716 = vrot.lane.b32.xlu1 %v2742_v53, %s2400_s10 }
 0x356   :  { %718 = vrot.lane.b32.xlu0 %v2744_v55, %s2400_s10  ;;  %978 = vmatpush1.bf16.msra.mxu0 %v2756_v19 }
 0x357   :  { %1064 = vmatpush1.bf16.msra.mxu1 %v2764_v22 }
 0x359   :  { %714 = vrot.lane.b32.xlu1 %v2739_v45, %s2400_s10 }
 0x35a   :  { %720 = vrot.lane.b32.xlu0 %v2746_v56, %s2400_s10 }
 0x35d   :  { %752 = vrot.lane.b32.xlu1 %v2744_v55, %s2401_s13 }
 0x35e   :  { %750 = vrot.lane.b32.xlu0 %v2742_v53, %s2401_s13 }
 0x361   :  { %754 = vrot.lane.b32.xlu1 %v2746_v56, %s2401_s13 }
 0x362   :  { %748 = vrot.lane.b32.xlu0 %v2739_v45, %s2401_s13 }
 0x365   :  { %784 = vrot.lane.b32.xlu1 %v2742_v53, %s2402_s0 }
 0x366   :  { %786 = vrot.lane.b32.xlu0 %v2744_v55, %s2402_s0 }
 0x369   :  { %782 = vrot.lane.b32.xlu1 %v2739_v45, %s2402_s0 }
 0x36a   :  { %788 = vrot.lane.b32.xlu0 %v2746_v56, %s2402_s0 }
 0x36d   :  { %820 = vrot.lane.b32.xlu1 %v2744_v55, %s2403_s14 }
 0x36e   :  { %818 = vrot.lane.b32.xlu0 %v2742_v53, %s2403_s14 }
 0x371   :  { %822 = vrot.lane.b32.xlu1 %v2746_v56, %s2403_s14 }
 0x372   :  { %816 = vrot.lane.b32.xlu0 %v2739_v45, %s2403_s14 }
 0x375   :  { %852 = vrot.lane.b32.xlu1 %v2742_v53, %s2404_s15 }
 0x376   :  { %854 = vrot.lane.b32.xlu0 %v2744_v55, %s2404_s15 }
 0x379   :  { %850 = vrot.lane.b32.xlu1 %v2739_v45, %s2404_s15 }
 0x37a   :  { %856 = vrot.lane.b32.xlu0 %v2746_v56, %s2404_s15 }
 0x37d   :  { %888 = vrot.lane.b32.xlu1 %v2744_v55, %s2405_s16 }
 0x37e   :  { %886 = vrot.lane.b32.xlu0 %v2742_v53, %s2405_s16 }
 0x381   :  { %890 = vrot.lane.b32.xlu1 %v2746_v56, %s2405_s16 }
 0x382   :  { %884 = vrot.lane.b32.xlu0 %v2739_v45, %s2405_s16 }
 0x385   :  { %920 = vrot.lane.b32.xlu1 %v2742_v53, %s2407_s17 }
 0x386   :  { %922 = vrot.lane.b32.xlu0 %v2744_v55, %s2407_s17 }
 0x389   :  { %692 = vrot.lane.b32.xlu1 %v2762_v21, %s2399_s9 }
 0x38a   :  { %694 = vrot.lane.b32.xlu0 %v2764_v22, %s2399_s9 }
 0x38d   :  { %690 = vrot.lane.b32.xlu1 %v2756_v19, %s2399_s9 }
 0x38e   :  { %696 = vrot.lane.b32.xlu0 %v2766_v16, %s2399_s9 }
 0x391   :  { %728 = vrot.lane.b32.xlu1 %v2764_v22, %s2400_s10 }
 0x392   :  { %726 = vrot.lane.b32.xlu0 %v2762_v21, %s2400_s10 }
 0x395   :  { %730 = vrot.lane.b32.xlu1 %v2766_v16, %s2400_s10 }
 0x396   :  { %724 = vrot.lane.b32.xlu0 %v2756_v19, %s2400_s10 }
 0x399   :  { %760 = vrot.lane.b32.xlu1 %v2762_v21, %s2401_s13 }
 0x39a   :  { %762 = vrot.lane.b32.xlu0 %v2764_v22, %s2401_s13 }
 0x39d   :  { %758 = vrot.lane.b32.xlu1 %v2756_v19, %s2401_s13 }
 0x39e   :  { %764 = vrot.lane.b32.xlu0 %v2766_v16, %s2401_s13 }
 0x3a1   :  { %796 = vrot.lane.b32.xlu1 %v2764_v22, %s2402_s0 }
 0x3a2   :  { %794 = vrot.lane.b32.xlu0 %v2762_v21, %s2402_s0 }
 0x3a5   :  { %798 = vrot.lane.b32.xlu1 %v2766_v16, %s2402_s0 }
 0x3a6   :  { %792 = vrot.lane.b32.xlu0 %v2756_v19, %s2402_s0 }
 0x3a9   :  { %828 = vrot.lane.b32.xlu1 %v2762_v21, %s2403_s14 }
 0x3aa   :  { %830 = vrot.lane.b32.xlu0 %v2764_v22, %s2403_s14 }
 0x3ad   :  { %826 = vrot.lane.b32.xlu1 %v2756_v19, %s2403_s14 }
 0x3ae   :  { %832 = vrot.lane.b32.xlu0 %v2766_v16, %s2403_s14 }
 0x3b1   :  { %864 = vrot.lane.b32.xlu1 %v2764_v22, %s2404_s15 }
 0x3b2   :  { %862 = vrot.lane.b32.xlu0 %v2762_v21, %s2404_s15 }
 0x3b5   :  { %866 = vrot.lane.b32.xlu1 %v2766_v16, %s2404_s15 }
 0x3b6   :  { %860 = vrot.lane.b32.xlu0 %v2756_v19, %s2404_s15 }
 0x3b9   :  { %896 = vrot.lane.b32.xlu1 %v2762_v21, %s2405_s16 }
 0x3ba   :  { %898 = vrot.lane.b32.xlu0 %v2764_v22, %s2405_s16 }
 0x3bd   :  { %894 = vrot.lane.b32.xlu1 %v2756_v19, %s2405_s16 }
 0x3be   :  { %900 = vrot.lane.b32.xlu0 %v2766_v16, %s2405_s16 }
 0x3bf   :  { %v685_v29 = vpop.permute.xlu1 %684 }
 0x3c0   :  { %v683_v20 = vpop.permute.xlu0 %682 }
 0x3c1   :  { %v699_v30 = vsel %vm70_vm0, %v683_v20, %v685_v29  ;;  %918 = vrot.lane.b32.xlu1 %v2739_v45, %s2407_s17 }
 0x3c2   :  { %924 = vrot.lane.b32.xlu0 %v2746_v56, %s2407_s17  ;;  %979 = vmatprep.subr.bf16.mxu0 %v699_v30 }
 0x3c3   :  { %v687_v32 = vpop.permute.xlu1 %686 }
 0x3c4   :  { %v681_v31 = vpop.permute.xlu0 %680  ;;  %v701_v14 = vsel %vm70_vm0, %v687_v32, %v2714_v49  ;;  %v700_v34 = vsel %vm70_vm0, %v685_v29, %v687_v32 }
 0x3c5   :  { %v698_v36 = vsel %vm70_vm0, %v681_v31, %v683_v20  ;;  %1065 = vmatprep.subr.bf16.mxu1 %v701_v14  ;;  %926 = vrot.lane.b32.xlu1 %v2409_v33, %s2407_s17 }
 0x3c6   :  { %930 = vrot.lane.b32.xlu0 %v2762_v21, %s2407_s17  ;;  %980 = vmatpush1.bf16.msra.mxu0 %v698_v36 }
 0x3c7   :  { %1066 = vmatpush1.bf16.msra.mxu1 %v700_v34  ;;  %v717_v35 = vpop.permute.xlu1 %716 }
 0x3c8   :  { %v719_v39 = vpop.permute.xlu0 %718 }
 0x3c9   :  { %932 = vrot.lane.b32.xlu1 %v2764_v22, %s2407_s17  ;;  %v733_v24 = vsel %vm90_vm1, %v717_v35, %v719_v39 }
 0x3ca   :  { %928 = vrot.lane.b32.xlu0 %v2756_v19, %s2407_s17 }
 0x3cb   :  { %v715_v17 = vpop.permute.xlu1 %714 }
 0x3cc   :  { %v721_v44 = vpop.permute.xlu0 %720  ;;  %v732_v19 = vsel %vm90_vm1, %v715_v17, %v717_v35 }
 0x3cd   :  { %934 = vrot.lane.b32.xlu1 %v2766_v16, %s2407_s17  ;;  %v735_v15 = vsel %vm90_vm1, %v721_v44, %v2716_v50  ;;  %v734_v22 = vsel %vm90_vm1, %v719_v39, %v721_v44 }
 0x3cf   :  { %v2906_v37 = vpop.permute.xlu1 %752 }
 0x3d0   :  { %v751_v58 = vpop.permute.xlu0 %750 }
 0x3d1   :  { %v767_v32 = vsel %vm110_vm3, %v751_v58, %v2906_v37 }
 0x3d3   :  { %v755_v38 = vpop.permute.xlu1 %754 }
 0x3d4   :  { %v749_v40 = vpop.permute.xlu0 %748  ;;  %v769_v31 = vsel %vm110_vm3, %v755_v38, %v2718_v51  ;;  %v768_v39 = vsel %vm110_vm3, %v2906_v37, %v755_v38 }
 0x3d5   :  { %v766_v34 = vsel %vm110_vm3, %v749_v40, %v751_v58 }
 0x3d7   :  { %v2908_v1 = vpop.permute.xlu1 %784 }
 0x3d8   :  { %v2910_v41 = vpop.permute.xlu0 %786 }
 0x3d9   :  { %v801_v58 = vsel %vm125_vm8, %v2908_v1, %v2910_v41 }
 0x3db   :  { %v2912_v42 = vpop.permute.xlu1 %782 }
 0x3dc   :  { %v2914_v43 = vpop.permute.xlu0 %788 }
 0x3dd   :  { %v803_v37 = vsel %vm125_vm8, %v2914_v43, %v2720_v52 }
 0x3df   :  { %v2916_v45 = vpop.permute.xlu1 %820 }
 0x3e0   :  { %v2918_v46 = vpop.permute.xlu0 %818 }
 0x3e3   :  { %v2920_v53 = vpop.permute.xlu1 %822 }
 0x3e4   :  { %v2922_v55 = vpop.permute.xlu0 %816 }
 0x3e7   :  { %v2924_v56 = vpop.permute.xlu1 %852 }
 0x3e8   :  { %v2926_v57 = vpop.permute.xlu0 %854 }
 0x3eb   :  { %v2928_v60 = vpop.permute.xlu1 %850 }
 0x3ec   :  { %v2930_v61 = vpop.permute.xlu0 %856 }
 0x3ef   :  { %v2932_v62 = vpop.permute.xlu1 %888 }
 0x3f0   :  { %v2934_v3 = vpop.permute.xlu0 %886 }
 0x3f3   :  { %v2936_v48 = vpop.permute.xlu1 %890 }
 0x3f4   :  { %v2938_v4 = vpop.permute.xlu0 %884 }
 0x3f7   :  { %v2940_v54 = vpop.permute.xlu1 %920 }
 0x3f8   :  { %v2942_v6 = vpop.permute.xlu0 %922 }
 0x3fb   :  { %v693_v7 = vpop.permute.xlu1 %692 }
 0x3fc   :  { %v695_v10 = vpop.permute.xlu0 %694 }
 0x3fd   :  { %v703_v47 = vsel %vm70_vm0, %v693_v7, %v695_v10 }
 0x3fe   :  { %981 = vmatprep.subr.bf16.mxu0 %v703_v47 }
 0x3ff   :  { %v691_v8 = vpop.permute.xlu1 %690 }
 0x400   :  { %v697_v9 = vpop.permute.xlu0 %696  ;;  %v702_v2 = vsel %vm70_vm0, %v691_v8, %v693_v7  ;;  %v800_v8 = vsel %vm125_vm8, %v2912_v42, %v2908_v1  ;;  %v835_v1 = vsel %vm140_vm6, %v2918_v46, %v2916_v45 }
 0x401   :  { %v705_v12 = vsel %vm70_vm0, %v697_v9, %v2714_v49  ;;  %v704_v13 = vsel %vm70_vm0, %v695_v10, %v697_v9  ;;  %982 = vmatpush1.bf16.msra.mxu0 %v702_v2  ;;  %v802_v2 = vsel %vm125_vm8, %v2910_v41, %v2914_v43  ;;  %v837_v41 = vsel %vm140_vm6, %v2920_v53, %v2726_v59 }
 0x402   :  { %1067 = vmatprep.subr.bf16.mxu1 %v705_v12  ;;  %983 = vmatprep.subr.bf16.mxu0 %v733_v24 }
 0x403   :  { %1068 = vmatpush1.bf16.msra.mxu1 %v704_v13  ;;  %v729_v28 = vpop.permute.xlu1 %728 }
 0x404   :  { %1069 = vmatprep.subr.bf16.mxu1 %v735_v15  ;;  %v727_v18 = vpop.permute.xlu0 %726 }
 0x405   :  { %v737_v21 = vsel %vm90_vm1, %v727_v18, %v729_v28  ;;  %984 = vmatpush1.bf16.msra.mxu0 %v732_v19 }
 0x406   :  { %985 = vmatprep.subr.bf16.mxu0 %v737_v21  ;;  %v836_v21 = vsel %vm140_vm6, %v2916_v45, %v2920_v53  ;;  %v871_v45 = vsel %vm155_vm7, %v2930_v61, %v2879_v26 }
 0x407   :  { %1070 = vmatpush1.bf16.msra.mxu1 %v734_v22  ;;  %v731_v16 = vpop.permute.xlu1 %730 }
 0x408   :  { %v725_v23 = vpop.permute.xlu0 %724  ;;  %v739_v20 = vsel %vm90_vm1, %v731_v16, %v2716_v50  ;;  %v738_v30 = vsel %vm90_vm1, %v729_v28, %v731_v16 }
 0x409   :  { %v736_v29 = vsel %vm90_vm1, %v725_v23, %v727_v18  ;;  %1071 = vmatprep.subr.bf16.mxu1 %v739_v20  ;;  %v834_v18 = vsel %vm140_vm6, %v2922_v55, %v2918_v46  ;;  %v869_v46 = vsel %vm155_vm7, %v2924_v56, %v2926_v57 }
 0x40a   :  { %986 = vmatpush1.bf16.msra.mxu0 %v736_v29 }
 0x40b   :  { %987 = vmatprep.subr.bf16.mxu0 %v767_v32  ;;  %1072 = vmatpush1.bf16.msra.mxu1 %v738_v30  ;;  %v761_v36 = vpop.permute.xlu1 %760  ;;  %v868_v30 = vsel %vm155_vm7, %v2928_v60, %v2924_v56  ;;  %v903_v56 = vsel %vm170_vm9, %v2934_v3, %v2932_v62 }
 0x40c   :  { %1073 = vmatprep.subr.bf16.mxu1 %v769_v31  ;;  %v763_v14 = vpop.permute.xlu0 %762  ;;  %v870_v31 = vsel %vm155_vm7, %v2926_v57, %v2930_v61  ;;  %v905_v57 = vsel %vm170_vm9, %v2936_v48, %v2881_v27 }
 0x40d   :  { %v771_v35 = vsel %vm110_vm3, %v761_v36, %v763_v14 }
 0x40e   :  { %988 = vmatpush1.bf16.msra.mxu0 %v766_v34 }
 0x40f   :  { %989 = vmatprep.subr.bf16.mxu0 %v771_v35  ;;  %1074 = vmatpush1.bf16.msra.mxu1 %v768_v39  ;;  %v759_v17 = vpop.permute.xlu1 %758 }
 0x410   :  { %v765_v44 = vpop.permute.xlu0 %764  ;;  %v770_v7 = vsel %vm110_vm3, %v759_v17, %v761_v36  ;;  %v902_v17 = vsel %vm170_vm9, %v2938_v4, %v2934_v3  ;;  %v2374_v3 = vld [vmem:[%s3511_s2] ss:$12 sps:$4 sm:$0xff]  }
 0x411   :  { %v773_v10 = vsel %vm110_vm3, %v765_v44, %v2718_v51  ;;  %v772_v47 = vsel %vm110_vm3, %v763_v14, %v765_v44 }
 0x412   :  { %990 = vmatpush1.bf16.msra.mxu0 %v770_v7  ;;  %1075 = vmatprep.subr.bf16.mxu1 %v773_v10  ;;  %v904_v7 = vsel %vm170_vm9, %v2932_v62, %v2936_v48  ;;  %v937_v62 = vsel %vm185_vm10, %v2940_v54, %v2942_v6 }
 0x413   :  { %991 = vmatprep.subr.bf16.mxu0 %v801_v58  ;;  %1076 = vmatpush1.bf16.msra.mxu1 %v772_v47  ;;  %v797_v38 = vpop.permute.xlu1 %796 }
 0x414   :  { %1077 = vmatprep.subr.bf16.mxu1 %v803_v37  ;;  %v795_v40 = vpop.permute.xlu0 %794 }
 0x415   :  { %v805_v9 = vsel %vm125_vm8, %v795_v40, %v797_v38 }
 0x416   :  { %992 = vmatpush1.bf16.msra.mxu0 %v800_v8 }
 0x417   :  { %993 = vmatprep.subr.bf16.mxu0 %v805_v9  ;;  %1078 = vmatpush1.bf16.msra.mxu1 %v802_v2  ;;  %v799_v12 = vpop.permute.xlu1 %798 }
 0x418   :  { %v793_v13 = vpop.permute.xlu0 %792  ;;  %v807_v15 = vsel %vm125_vm8, %v799_v12, %v2720_v52  ;;  %v806_v28 = vsel %vm125_vm8, %v797_v38, %v799_v12 }
 0x419   :  { %v804_v24 = vsel %vm125_vm8, %v793_v13, %v795_v40  ;;  %1079 = vmatprep.subr.bf16.mxu1 %v807_v15 }
 0x41a   :  { %994 = vmatpush1.bf16.msra.mxu0 %v804_v24 }
 0x41b   :  { %995 = vmatprep.subr.bf16.mxu0 %v835_v1  ;;  %1080 = vmatpush1.bf16.msra.mxu1 %v806_v28  ;;  %v829_v42 = vpop.permute.xlu1 %828  ;;  %v2377_v28 = vld [vmem:[%s3511_s2 + $0x8] ss:$12 sps:$4 sm:$0xff]  }
 0x41c   :  { %1081 = vmatprep.subr.bf16.mxu1 %v837_v41  ;;  %v831_v43 = vpop.permute.xlu0 %830 }
 0x41d   :  { %v839_v19 = vsel %vm140_vm6, %v829_v42, %v831_v43 }
 0x41e   :  { %996 = vmatpush1.bf16.msra.mxu0 %v834_v18  ;;  %v3068_v18 = vld [vmem:[%s3509_s7] sm:$0xff] }
 0x41f   :  { %997 = vmatprep.subr.bf16.mxu0 %v839_v19  ;;  %1082 = vmatpush1.bf16.msra.mxu1 %v836_v21  ;;  %v827_v22 = vpop.permute.xlu1 %826 }
 0x420   :  { %v833_v16 = vpop.permute.xlu0 %832  ;;  %v838_v23 = vsel %vm140_vm6, %v827_v22, %v829_v42  ;;  %v1149_v42 = vsub.s32 1, %v2618_v0 }
 0x421   :  { %v841_v29 = vsel %vm140_vm6, %v833_v16, %v2726_v59  ;;  %v840_v20 = vsel %vm140_vm6, %v831_v43, %v833_v16  ;;  %v1153_v43 = vsub.s32 5, %v2618_v0  ;;  %v3075_v16 = vld [vmem:[%s3509_s7 + $0x8] sm:$0xff] }
 0x422   :  { %998 = vmatpush1.bf16.msra.mxu0 %v838_v23  ;;  %1083 = vmatprep.subr.bf16.mxu1 %v841_v29  ;;  %v1150_v19 = vrot.slane %v3068_v18, %v1149_v42  ;;  %v1158_v23 = vrot.slane %v3075_v16, %v1149_v42 }
 0x423   :  { %999 = vmatprep.subr.bf16.mxu0 %v869_v46  ;;  %1084 = vmatpush1.bf16.msra.mxu1 %v840_v20  ;;  %v865_v53 = vpop.permute.xlu1 %864  ;;  %v1154_v21 = vrot.slane %v3068_v18, %v1153_v43  ;;  %v1162_v20 = vrot.slane %v3075_v16, %v1153_v43 }
 0x424   :  { %1085 = vmatprep.subr.bf16.mxu1 %v871_v45  ;;  %v863_v55 = vpop.permute.xlu0 %862  ;;  %v1170_v22 = vrot.slane %v1150_v19, %v1149_v42 }
 0x425   :  { %v873_v32 = vsel %vm155_vm7, %v863_v55, %v865_v53  ;;  %v1174_v29 = vrot.slane %v1154_v21, %v1149_v42 }
 0x426   :  { %1000 = vmatpush1.bf16.msra.mxu0 %v868_v30 }
 0x427   :  { %1001 = vmatprep.subr.bf16.mxu0 %v873_v32  ;;  %1086 = vmatpush1.bf16.msra.mxu1 %v870_v31  ;;  %v867_v36 = vpop.permute.xlu1 %866  ;;  %v1182_v31 = vrot.slane %v1162_v20, %v1149_v42 }
 0x428   :  { %v861_v14 = vpop.permute.xlu0 %860  ;;  %v875_v35 = vsel %vm155_vm7, %v867_v36, %v2879_v26  ;;  %v874_v39 = vsel %vm155_vm7, %v865_v53, %v867_v36 }
 0x429   :  { %v872_v34 = vsel %vm155_vm7, %v861_v14, %v863_v55  ;;  %1087 = vmatprep.subr.bf16.mxu1 %v875_v35  ;;  %v1178_v55 = vrot.slane %v1158_v23, %v1149_v42 }
 0x42a   :  { %1002 = vmatpush1.bf16.msra.mxu0 %v872_v34 }
 0x42b   :  { %1003 = vmatprep.subr.bf16.mxu0 %v903_v56  ;;  %1088 = vmatpush1.bf16.msra.mxu1 %v874_v39  ;;  %v897_v60 = vpop.permute.xlu1 %896 }
 0x42c   :  { %1089 = vmatprep.subr.bf16.mxu1 %v905_v57  ;;  %v899_v61 = vpop.permute.xlu0 %898 }
 0x42d   :  { %v907_v44 = vsel %vm170_vm9, %v897_v60, %v899_v61 }
 0x42e   :  { %1004 = vmatpush1.bf16.msra.mxu0 %v902_v17 }
 0x42f   :  { %1005 = vmatprep.subr.bf16.mxu0 %v907_v44  ;;  %1090 = vmatpush1.bf16.msra.mxu1 %v904_v7  ;;  %v895_v10 = vpop.permute.xlu1 %894 }
 0x430   :  { %v901_v47 = vpop.permute.xlu0 %900  ;;  %v906_v58 = vsel %vm170_vm9, %v895_v10, %v897_v60 }
 0x431   :  { %v909_v37 = vsel %vm170_vm9, %v901_v47, %v2881_v27  ;;  %v908_v38 = vsel %vm170_vm9, %v899_v61, %v901_v47 }
 0x432   :  { %1006 = vmatpush1.bf16.msra.mxu0 %v906_v58  ;;  %1091 = vmatprep.subr.bf16.mxu1 %v909_v37 }
 0x433   :  { %1018 = vmatprep.subr.bf16.mxu0 %v937_v62  ;;  %1092 = vmatpush1.bf16.msra.mxu1 %v908_v38  ;;  %v919_v48 = vpop.permute.xlu1 %918 }
 0x434   :  { %v925_v4 = vpop.permute.xlu0 %924  ;;  %v936_v40 = vsel %vm185_vm10, %v919_v48, %v2940_v54 }
 0x435   :  { %1008 = vmatmul.mubr.bf16.vlgmr.msra.gmra.mrb[8].mxu0 %v2374_v3  ;;  %v938_v12 = vsel %vm185_vm10, %v2942_v6, %v925_v4 }
 0x436   :  { %1019 = vmatpush1.bf16.msra.mxu0 %v936_v40  ;;  %1094 = vmatmul.mubr.bf16.vlgmr.msra.gmra.mrb[8].mxu1 %v2374_v3 }
 0x437   :  { %1050 = vmatprep.mubr.bf16.mxu0 %v2406_v25  ;;  %1136 = vmatprep.mubr.bf16.mxu1 %v2406_v25  ;;  %v3049_v9 = vpop.permute.xlu1 %926 }
 0x438   :  { %v931_v8 = vpop.permute.xlu0 %930  ;;  %v939_v2 = vsel %vm185_vm10, %v925_v4, %v3049_v9 }
 0x439   :  { %1104 = vmatprep.subr.bf16.mxu1 %v939_v2 }
 0x43a   :  { %1105 = vmatpush1.bf16.msra.mxu1 %v938_v12 }
 0x43b   :  { %v933_v54 = vpop.permute.xlu1 %932 }
 0x43c   :  { %v929_v13 = vpop.permute.xlu0 %928  ;;  %v941_v15 = vsel %vm185_vm10, %v931_v8, %v933_v54 }
 0x43d   :  { %v940_v24 = vsel %vm185_vm10, %v929_v13, %v931_v8  ;;  %1020 = vmatprep.subr.bf16.mxu0 %v941_v15 }
 0x43e   :  { %1021 = vmatpush1.bf16.msra.mxu0 %v940_v24 }
 0x43f   :  { %v935_v1 = vpop.permute.xlu1 %934 }
 0x440   :  { %v943_v41 = vsel %vm185_vm10, %v935_v1, %v3049_v9  ;;  %v942_v6 = vsel %vm185_vm10, %v933_v54, %v935_v1 }
 0x441   :  { %2316 = vmatmul.mubr.msk.bf16.vlgmr.msra.gmra.mrb[8].mxu0 %vm971_vm12, %v2377_v28  ;;  %1106 = vmatprep.subr.bf16.mxu1 %v943_v41  ;;  %v2411_v41 = vmov 2  }
 0x442   :  { %1107 = vmatpush1.bf16.msra.mxu1 %v942_v6  ;;  %2362 = vset.pattern.permute.xlu1 %v2411_v41 }
 0x445   :  { %2317 = vmatmul.mubr.msk.bf16.vlgmr.msra.gmra.mrb[8].mxu1 %vm971_vm12, %v2377_v28 }
 0x514   :  { %v3079_v46 = vpop.f32.mrb[8].mxu0 }
 0x515   :  { %v1183_v45 = vmul.f32 %v1170_v22, %v3079_v46  ;;  %v3082_v53 = vpop.f32.mrb[9].mxu0 }
 0x516   :  { %v1184_v30 = vmul.f32 %v1174_v29, %v3082_v53  ;;  %v3085_v32 = vpop.f32.mrb[10].mxu0 }
 0x517   :  { %v1201_v36 = vmul.f32 %v1183_v45, %v1183_v45  ;;  %v1187_v14 = vmul.f32 %v1170_v22, %v3085_v32  ;;  %v3088_v34 = vpop.f32.mrb[11].mxu0 }
 0x518   :  { %v1191_v35 = vadd.f32 %v1184_v30, %v1183_v45  ;;  %v1202_v39 = vmul.f32 %v1184_v30, %v1184_v30  ;;  %v1188_v56 = vmul.f32 %v1174_v29, %v3088_v34  ;;  %v3091_v57 = vpop.f32.mrb[8].mxu1 }
 0x519   :  { %v1205_v60 = vmul.f32 %v1187_v14, %v1187_v14  ;;  %v1185_v61 = vmul.f32 %v1178_v55, %v3091_v57  ;;  %v3094_v17 = vpop.f32.mrb[9].mxu1 }
 0x51a   :  { %v1209_v44 = vadd.f32 %v1202_v39, %v1201_v36  ;;  %v1196_v7 = vadd.f32 %v1188_v56, %v1187_v14  ;;  %v1206_v10 = vmul.f32 %v1188_v56, %v1188_v56  ;;  %v1186_v47 = vmul.f32 %v1182_v31, %v3094_v17  ;;  %v3097_v58 = vpop.f32.mrb[10].mxu1 }
 0x51b   :  { %v1192_v37 = vadd.f32 %v1191_v35, %v1185_v61  ;;  %v1203_v38 = vmul.f32 %v1185_v61, %v1185_v61  ;;  %v1189_v3 = vmul.f32 %v1178_v55, %v3097_v58  ;;  %v3100_v62 = vpop.f32.mrb[11].mxu1  ;;  %v2412_v14 = vmov 3  }
 0x51c   :  { %v1214_v48 = vadd.f32 %v1206_v10, %v1205_v60  ;;  %v1204_v4 = vmul.f32 %v1186_v47, %v1186_v47  ;;  %v1190_v40 = vmul.f32 %v1182_v31, %v3100_v62  ;;  %2363 = vset.pattern.permute.xlu0 %v2412_v14 }
 0x51d   :  { %v1210_v8 = vadd.f32 %v1209_v44, %v1203_v38  ;;  %v1193_v2 = vadd.f32 %v1192_v37, %v1186_v47  ;;  %v1197_v12 = vadd.f32 %v1196_v7, %v1189_v3  ;;  %v1207_v13 = vmul.f32 %v1189_v3, %v1189_v3 }
 0x51e   :  { %v1208_v54 = vmul.f32 %v1190_v40, %v1190_v40 }
 0x51f   :  { %v1215_v24 = vadd.f32 %v1214_v48, %v1207_v13  ;;  %v1198_v15 = vadd.f32 %v1197_v12, %v1190_v40  ;;  %1194 = vadd.xlane.f32.xlu0 %v1193_v2  ;;  %v1211_v28 = vadd.f32 %v1210_v8, %v1204_v4 }
 0x521   :  { %1199 = vadd.xlane.f32.xlu1 %v1198_v15  ;;  %v1216_v1 = vadd.f32 %v1215_v24, %v1208_v54 }
 0x523   :  { %1212 = vadd.xlane.f32.xlu0 %v1211_v28 }
 0x527   :  { %1217 = vadd.xlane.f32.xlu0 %v1216_v1 }
 0x5ac   :  { %v1195_v6 = vpop.xlane.xlu0 %1194 }
 0x5ad   :  { %v1219_v42 = vmul.f32 0.0034722222, %v1195_v6 }
 0x5ae   :  { %v1200_v43 = vpop.xlane.xlu1 %1199 }
 0x5af   :  { %v1223_v21 = vmul.f32 %v1219_v42, %v1219_v42  ;;  %v1220_v22 = vmul.f32 0.0034722222, %v1200_v43 }
 0x5b0   :  { %v1213_v19 = vpop.xlane.xlu0 %1212 }
 0x5b1   :  { %v1221_v23 = vmul.f32 0.0034722222, %v1213_v19  ;;  %v1224_v45 = vmul.f32 %v1220_v22, %v1220_v22 }
 0x5b3   :  { %v1225_v29 = vsub.f32 %v1221_v23, %v1223_v21 }
 0x5b4   :  { %v1218_v20 = vpop.xlane.xlu0 %1217 }
 0x5b5   :  { %v1227_v55 = vadd.f32 1e-05, %v1225_v29  ;;  %v1222_v30 = vmul.f32 0.0034722222, %v1218_v20 }
 0x5b7   :  { %2388 = vrsqrt.f32 %v1227_v55  ;;  %v1226_v31 = vsub.f32 %v1222_v30, %v1224_v45 }
 0x5b9   :  { %v1228_v36 = vadd.f32 1e-05, %v1226_v31 }
 0x5bb   :  { %2390 = vrsqrt.f32 %v1228_v36 }
 0x5c1   :  { %v2389_v35 = vpop.eup %2388 }
 0x5c2   :  { %v1231_v39 = vmul.f32 %v2389_v35, %v2679_v5  ;;  %v3145_v35 = vld [vmem:[%s3512_s3] sm:$0xff] }
 0x5c4   :  { %v1233_v56 = vmul.f32 %v1231_v39, %v1219_v42 }
 0x5c5   :  { %v2391_v60 = vpop.eup %2390 }
 0x5c6   :  { %1237 = vrot.lane.b32.xlu1 %v1233_v56, %s2408_s29  ;;  %v1232_v61 = vmul.f32 %v2391_v60, %v2685_v11 }
 0x5c8   :  { %v1234_v44 = vmul.f32 %v1232_v61, %v1220_v22 }
 0x5ca   :  { %1247 = vperm.xlu1 %2362, %v1231_v39   ;;  %1239 = vrot.lane.b32.xlu0 %v1234_v44, %s2408_s29  ;;  %v2319_v39 = vcombine.high %v3145_v35, %v3145_v35 }
 0x5cc   :  { %2320 = vmatprep.mubr.msk.bf16.mxu0 %vm1440_vm13, %v2319_v39  ;;  %2321 = vmatprep.mubr.msk.bf16.mxu1 %vm1440_vm13, %v2319_v39 }
 0x5ce   :  { %1252 = vperm.xlu1 %2362, %v1232_v61  }
 0x5d2   :  { %2364 = vset.pattern.permute.xlu1 %v2412_v14 }
 0x638   :  { %v1238_v7 = vpop.permute.xlu1 %1237 }
 0x639   :  { %v1243_v10 = vsub.f32 %v2679_v5, %v1238_v7 }
 0x63b   :  { %1265 = vperm.xlu0 %2363, %v1243_v10  }
 0x63c   :  { %v1240_v47 = vpop.permute.xlu0 %1239 }
 0x63d   :  { %v1244_v37 = vsub.f32 %v2685_v11, %v1240_v47 }
 0x63f   :  { %1270 = vperm.xlu1 %2364, %v1244_v37  }
 0x649   :  { %v1248_v38 = vpop.permute.xlu1 %1247 }
 0x64a   :  { %v1255_v3 = vmul.f32 %v1248_v38, %v3079_v46  ;;  %v1256_v48 = vmul.f32 %v1248_v38, %v3082_v53  ;;  %v1257_v4 = vmul.f32 %v1248_v38, %v3091_v57  ;;  %v1258_v40 = vmul.f32 %v1248_v38, %v3094_v17 }
 0x64d   :  { %v1253_v8 = vpop.permute.xlu1 %1252 }
 0x64e   :  { %v1259_v24 = vmul.f32 %v1253_v8, %v3085_v32  ;;  %v1260_v11 = vmul.f32 %v1253_v8, %v3088_v34  ;;  %v1261_v15 = vmul.f32 %v1253_v8, %v3097_v58  ;;  %v1262_v46 = vmul.f32 %v1253_v8, %v3100_v62 }
 0x6ba   :  { %v1266_v2 = vpop.permute.xlu0 %1265 }
 0x6bb   :  { %v1273_v12 = vadd.f32 %v1266_v2, %v1255_v3  ;;  %v1274_v13 = vadd.f32 %v1266_v2, %v1256_v48  ;;  %v1275_v54 = vadd.f32 %v1266_v2, %v1257_v4  ;;  %v1276_v5 = vadd.f32 %v1266_v2, %v1258_v40 }
 0x6bd   :  { %v1281_v53 = vmul.f32 0.2, %v1273_v12  ;;  %v1282_v1 = vmul.f32 0.2, %v1274_v13  ;;  %v1283_v57 = vmul.f32 0.2, %v1275_v54 }
 0x6be   :  { %v1271_v28 = vpop.permute.xlu1 %1270  ;;  %v1284_v17 = vmul.f32 0.2, %v1276_v5 }
 0x6bf   :  { %v1277_v41 = vadd.f32 %v1271_v28, %v1259_v24  ;;  %v1278_v6 = vadd.f32 %v1271_v28, %v1260_v11  ;;  %v1279_v42 = vadd.f32 %v1271_v28, %v1261_v15  ;;  %v1280_v43 = vadd.f32 %v1271_v28, %v1262_v46 }
 0x6c0   :  { %v1289_v32 = vmax.f32 %v1273_v12, %v1281_v53  ;;  %v1290_v29 = vmax.f32 %v1274_v13, %v1282_v1  ;;  %v1291_v34 = vmax.f32 %v1275_v54, %v1283_v57  ;;  %v1292_v58 = vmax.f32 %v1276_v5, %v1284_v17 }
 0x6c1   :  { %v1285_v19 = vmul.f32 0.2, %v1277_v41  ;;  %v1286_v21 = vmul.f32 0.2, %v1278_v6  ;;  %v1287_v22 = vmul.f32 0.2, %v1279_v42 }
 0x6c2   :  { %v1288_v23 = vmul.f32 0.2, %v1280_v43 }
 0x6c3   :  { %v1293_v20 = vmax.f32 %v1277_v41, %v1285_v19  ;;  %v1294_v45 = vmax.f32 %v1278_v6, %v1286_v21  ;;  %v1295_v62 = vmax.f32 %v1279_v42, %v1287_v22 }
 0x6c4   :  { %v1296_v55 = vmax.f32 %v1280_v43, %v1288_v23 }
 0x6c5   :  { %v1297_v30 = vpack.c.bf16 %v1293_v20, %v1289_v32  ;;  %v1298_v31 = vpack.c.bf16 %v1294_v45, %v1290_v29  ;;  %v1299_v36 = vpack.c.bf16 %v1295_v62, %v1291_v34 }
 0x6c6   :  { %v1300_v14 = vpack.c.bf16 %v1296_v55, %v1292_v58 }
 0x6c7   :  { %1309 = vrot.lane.b32.xlu0 %v1299_v36, %s2399_s9  ;;  %1307 = vrot.lane.b32.xlu1 %v1298_v31, %s2399_s9 }
 0x6c8   :  { %1485 = vmatprep.subr.bf16.mxu1 %v1300_v14  ;;  %1444 = vmatprep.subr.bf16.mxu0 %v1298_v31 }
 0x6c9   :  { %1445 = vmatpush1.bf16.msra.mxu0 %v1297_v30  ;;  %1486 = vmatpush1.bf16.msra.mxu1 %v1299_v36 }
 0x6cb   :  { %1311 = vrot.lane.b32.xlu0 %v1300_v14, %s2399_s9  ;;  %1305 = vrot.lane.b32.xlu1 %v1297_v30, %s2399_s9 }
 0x6cf   :  { %1325 = vrot.lane.b32.xlu0 %v1299_v36, %s2400_s10  ;;  %1323 = vrot.lane.b32.xlu1 %v1298_v31, %s2400_s10 }
 0x6d3   :  { %1327 = vrot.lane.b32.xlu0 %v1300_v14, %s2400_s10  ;;  %1321 = vrot.lane.b32.xlu1 %v1297_v30, %s2400_s10 }
 0x6d7   :  { %1341 = vrot.lane.b32.xlu0 %v1299_v36, %s2401_s13  ;;  %1339 = vrot.lane.b32.xlu1 %v1298_v31, %s2401_s13 }
 0x6db   :  { %1343 = vrot.lane.b32.xlu0 %v1300_v14, %s2401_s13  ;;  %1337 = vrot.lane.b32.xlu1 %v1297_v30, %s2401_s13 }
 0x6df   :  { %1357 = vrot.lane.b32.xlu0 %v1299_v36, %s2402_s0  ;;  %1355 = vrot.lane.b32.xlu1 %v1298_v31, %s2402_s0 }
 0x6e3   :  { %1359 = vrot.lane.b32.xlu0 %v1300_v14, %s2402_s0  ;;  %1353 = vrot.lane.b32.xlu1 %v1297_v30, %s2402_s0 }
 0x6e7   :  { %1373 = vrot.lane.b32.xlu0 %v1299_v36, %s2403_s14  ;;  %1371 = vrot.lane.b32.xlu1 %v1298_v31, %s2403_s14 }
 0x6eb   :  { %1375 = vrot.lane.b32.xlu0 %v1300_v14, %s2403_s14  ;;  %1369 = vrot.lane.b32.xlu1 %v1297_v30, %s2403_s14 }
 0x6ef   :  { %1389 = vrot.lane.b32.xlu0 %v1299_v36, %s2404_s15  ;;  %1387 = vrot.lane.b32.xlu1 %v1298_v31, %s2404_s15 }
 0x6f3   :  { %1391 = vrot.lane.b32.xlu0 %v1300_v14, %s2404_s15  ;;  %1385 = vrot.lane.b32.xlu1 %v1297_v30, %s2404_s15 }
 0x6f7   :  { %1405 = vrot.lane.b32.xlu0 %v1299_v36, %s2405_s16  ;;  %1403 = vrot.lane.b32.xlu1 %v1298_v31, %s2405_s16 }
 0x6fb   :  { %1407 = vrot.lane.b32.xlu0 %v1300_v14, %s2405_s16  ;;  %1401 = vrot.lane.b32.xlu1 %v1297_v30, %s2405_s16 }
 0x6ff   :  { %1421 = vrot.lane.b32.xlu0 %v1299_v36, %s2407_s17  ;;  %1419 = vrot.lane.b32.xlu1 %v1298_v31, %s2407_s17 }
 0x703   :  { %1423 = vrot.lane.b32.xlu0 %v1300_v14, %s2407_s17  ;;  %1417 = vrot.lane.b32.xlu1 %v1297_v30, %s2407_s17 }
 0x739   :  { %v1310_v56 = vpop.permute.xlu0 %1309  ;;  %v1308_v60 = vpop.permute.xlu1 %1307 }
 0x73a   :  { %v1314_v61 = vsel %vm70_vm0, %v1308_v60, %v1310_v56 }
 0x73b   :  { %1446 = vmatprep.subr.bf16.mxu0 %v1314_v61 }
 0x73d   :  { %v1312_v44 = vpop.permute.xlu0 %1311  ;;  %v1306_v7 = vpop.permute.xlu1 %1305 }
 0x73e   :  { %v1316_v10 = vsel %vm70_vm0, %v1312_v44, %v2714_v49  ;;  %v1315_v47 = vsel %vm70_vm0, %v1310_v56, %v1312_v44  ;;  %v1313_v37 = vsel %vm70_vm0, %v1306_v7, %v1308_v60 }
 0x73f   :  { %1487 = vmatprep.subr.bf16.mxu1 %v1316_v10  ;;  %1447 = vmatpush1.bf16.msra.mxu0 %v1313_v37 }
 0x740   :  { %1488 = vmatpush1.bf16.msra.mxu1 %v1315_v47 }
 0x741   :  { %v1326_v38 = vpop.permute.xlu0 %1325  ;;  %v1324_v3 = vpop.permute.xlu1 %1323 }
 0x742   :  { %v1330_v48 = vsel %vm90_vm1, %v1324_v3, %v1326_v38 }
 0x743   :  { %1448 = vmatprep.subr.bf16.mxu0 %v1330_v48 }
 0x745   :  { %v1328_v4 = vpop.permute.xlu0 %1327  ;;  %v1322_v40 = vpop.permute.xlu1 %1321 }
 0x746   :  { %v1332_v8 = vsel %vm90_vm1, %v1328_v4, %v2716_v50  ;;  %v1331_v2 = vsel %vm90_vm1, %v1326_v38, %v1328_v4  ;;  %v1329_v49 = vsel %vm90_vm1, %v1322_v40, %v1324_v3  ;;  %v1528_v40 = vsub.s32 2, %v2618_v0 }
 0x747   :  { %1489 = vmatprep.subr.bf16.mxu1 %v1332_v8  ;;  %1449 = vmatpush1.bf16.msra.mxu0 %v1329_v49  ;;  %v1532_v8 = vsub.s32 6, %v2618_v0 }
 0x748   :  { %1490 = vmatpush1.bf16.msra.mxu1 %v1331_v2  ;;  %v1529_v2 = vrot.slane %v3068_v18, %v1528_v40  ;;  %v1537_v49 = vrot.slane %v3075_v16, %v1528_v40 }
 0x749   :  { %v1342_v12 = vpop.permute.xlu0 %1341  ;;  %v1340_v13 = vpop.permute.xlu1 %1339 }
 0x74a   :  { %v1346_v54 = vsel %vm110_vm3, %v1340_v13, %v1342_v12 }
 0x74b   :  { %1450 = vmatprep.subr.bf16.mxu0 %v1346_v54  ;;  %v1557_v54 = vrot.slane %v1537_v49, %v1528_v40 }
 0x74d   :  { %v1344_v5 = vpop.permute.xlu0 %1343  ;;  %v1338_v24 = vpop.permute.xlu1 %1337 }
 0x74e   :  { %v1348_v11 = vsel %vm110_vm3, %v1344_v5, %v2718_v51  ;;  %v1347_v15 = vsel %vm110_vm3, %v1342_v12, %v1344_v5  ;;  %v1345_v46 = vsel %vm110_vm3, %v1338_v24, %v1340_v13  ;;  %v1533_v12 = vrot.slane %v3068_v18, %v1532_v8 }
 0x74f   :  { %1491 = vmatprep.subr.bf16.mxu1 %v1348_v11  ;;  %1451 = vmatpush1.bf16.msra.mxu0 %v1345_v46  ;;  %v1549_v13 = vrot.slane %v1529_v2, %v1528_v40 }
 0x750   :  { %1492 = vmatpush1.bf16.msra.mxu1 %v1347_v15  ;;  %v1553_v5 = vrot.slane %v1533_v12, %v1528_v40 }
 0x751   :  { %v1358_v28 = vpop.permute.xlu0 %1357  ;;  %v1356_v53 = vpop.permute.xlu1 %1355 }
 0x752   :  { %v1362_v1 = vsel %vm125_vm8, %v1356_v53, %v1358_v28 }
 0x753   :  { %1452 = vmatprep.subr.bf16.mxu0 %v1362_v1 }
 0x755   :  { %v1360_v57 = vpop.permute.xlu0 %1359  ;;  %v1354_v17 = vpop.permute.xlu1 %1353 }
 0x756   :  { %v1363_v41 = vsel %vm125_vm8, %v1358_v28, %v1360_v57  ;;  %v1364_v6 = vsel %vm125_vm8, %v1360_v57, %v2720_v52  ;;  %v1361_v51 = vsel %vm125_vm8, %v1354_v17, %v1356_v53 }
 0x757   :  { %1493 = vmatprep.subr.bf16.mxu1 %v1364_v6  ;;  %1453 = vmatpush1.bf16.msra.mxu0 %v1361_v51 }
 0x758   :  { %1494 = vmatpush1.bf16.msra.mxu1 %v1363_v41 }
 0x759   :  { %v1374_v42 = vpop.permute.xlu0 %1373  ;;  %v1372_v43 = vpop.permute.xlu1 %1371 }
 0x75a   :  { %v1378_v19 = vsel %vm140_vm6, %v1372_v43, %v1374_v42 }
 0x75b   :  { %1454 = vmatprep.subr.bf16.mxu0 %v1378_v19 }
 0x75d   :  { %v1376_v21 = vpop.permute.xlu0 %1375  ;;  %v1370_v23 = vpop.permute.xlu1 %1369 }
 0x75e   :  { %v1379_v22 = vsel %vm140_vm6, %v1374_v42, %v1376_v21  ;;  %v1380_v32 = vsel %vm140_vm6, %v1376_v21, %v2726_v59  ;;  %v1377_v29 = vsel %vm140_vm6, %v1370_v23, %v1372_v43 }
 0x75f   :  { %1495 = vmatprep.subr.bf16.mxu1 %v1380_v32  ;;  %1455 = vmatpush1.bf16.msra.mxu0 %v1377_v29 }
 0x760   :  { %1496 = vmatpush1.bf16.msra.mxu1 %v1379_v22 }
 0x761   :  { %v1390_v34 = vpop.permute.xlu0 %1389  ;;  %v1388_v20 = vpop.permute.xlu1 %1387 }
 0x762   :  { %v1394_v58 = vsel %vm155_vm7, %v1388_v20, %v1390_v34 }
 0x763   :  { %1456 = vmatprep.subr.bf16.mxu0 %v1394_v58 }
 0x765   :  { %v1392_v45 = vpop.permute.xlu0 %1391  ;;  %v1386_v55 = vpop.permute.xlu1 %1385 }
 0x766   :  { %v1395_v62 = vsel %vm155_vm7, %v1390_v34, %v1392_v45  ;;  %v1396_v30 = vsel %vm155_vm7, %v1392_v45, %v2879_v26  ;;  %v1393_v31 = vsel %vm155_vm7, %v1386_v55, %v1388_v20  ;;  %v2413_v45 = vmov 4  }
 0x767   :  { %1497 = vmatprep.subr.bf16.mxu1 %v1396_v30  ;;  %1457 = vmatpush1.bf16.msra.mxu0 %v1393_v31 }
 0x768   :  { %1498 = vmatpush1.bf16.msra.mxu1 %v1395_v62  ;;  %2365 = vset.pattern.permute.xlu1 %v2413_v45 }
 0x769   :  { %v1406_v59 = vpop.permute.xlu0 %1405  ;;  %v1404_v36 = vpop.permute.xlu1 %1403 }
 0x76a   :  { %v1410_v14 = vsel %vm170_vm9, %v1404_v36, %v1406_v59 }
 0x76b   :  { %1458 = vmatprep.subr.bf16.mxu0 %v1410_v14 }
 0x76d   :  { %v1408_v39 = vpop.permute.xlu0 %1407  ;;  %v1402_v60 = vpop.permute.xlu1 %1401 }
 0x76e   :  { %v1411_v56 = vsel %vm170_vm9, %v1406_v59, %v1408_v39  ;;  %v1412_v61 = vsel %vm170_vm9, %v1408_v39, %v2881_v27  ;;  %v1409_v44 = vsel %vm170_vm9, %v1402_v60, %v1404_v36  ;;  %v2318_v27 = vcombine.low %v3145_v35, %v3145_v35 }
 0x76f   :  { %1499 = vmatprep.subr.bf16.mxu1 %v1412_v61  ;;  %1459 = vmatpush1.bf16.msra.mxu0 %v1409_v44  ;;  %v1541_v35 = vrot.slane %v3075_v16, %v1532_v8  ;;  %v2414_v44 = vmov 5  }
 0x770   :  { %1500 = vmatpush1.bf16.msra.mxu1 %v1411_v56  ;;  %v3209_v56 = vld [vmem:[%s3510_s6] sm:$0xff] }
 0x771   :  { %v1422_v7 = vpop.permute.xlu0 %1421  ;;  %v1420_v10 = vpop.permute.xlu1 %1419  ;;  %v1561_v15 = vrot.slane %v1541_v35, %v1528_v40 }
 0x772   :  { %v1426_v47 = vsel %vm185_vm10, %v1420_v10, %v1422_v7 }
 0x773   :  { %1460 = vmatprep.subr.bf16.mxu0 %v1426_v47  ;;  %v1631_v47 = vrot.slane %v2409_v33, 4 }
 0x775   :  { %v1424_v37 = vpop.permute.xlu0 %1423  ;;  %v1418_v3 = vpop.permute.xlu1 %1417 }
 0x776   :  { %v1427_v38 = vsel %vm185_vm10, %v1422_v7, %v1424_v37  ;;  %v1428_v48 = vsel %vm185_vm10, %v1424_v37, %v3049_v9  ;;  %v1425_v4 = vsel %vm185_vm10, %v1418_v3, %v1420_v10 }
 0x777   :  { %1501 = vmatprep.subr.bf16.mxu1 %v1428_v48  ;;  %1461 = vmatpush1.bf16.msra.mxu0 %v1425_v4 }
 0x778   :  { %1502 = vmatpush1.bf16.msra.mxu1 %v1427_v38 }
 0x77a   :  { %1477 = vmatmul.mubr.bf16.vlgmr.msra.gmra.mrb[12].mxu0 %v2318_v27 }
 0x77b   :  { %1518 = vmatmul.mubr.bf16.vlgmr.msra.gmra.mrb[12].mxu1 %v2318_v27  ;;  %1849 = vmatprep.mubr.bf16.mxu0 %v2406_v25 }
 0x77c   :  { %1890 = vmatprep.mubr.bf16.mxu1 %v2406_v25 }
 0x84d   :  { %v1478_v24 = vpop.f32.mrb[12].mxu0 }
 0x84e   :  { %v1519_v11 = vpop.f32.mrb[12].mxu1  ;;  %v1562_v46 = vmul.f32 %v1549_v13, %v1478_v24  ;;  %v1480_v28 = vpop.f32.mrb[13].mxu0 }
 0x84f   :  { %v1564_v53 = vmul.f32 %v1557_v54, %v1519_v11  ;;  %v1521_v1 = vpop.f32.mrb[13].mxu1  ;;  %v1563_v57 = vmul.f32 %v1553_v5, %v1480_v28  ;;  %v1482_v41 = vpop.f32.mrb[14].mxu0 }
 0x850   :  { %v1523_v17 = vpop.f32.mrb[14].mxu1  ;;  %v1571_v6 = vmul.f32 %v1562_v46, %v1562_v46  ;;  %v1483_v51 = vpop.f32.mrb[15].mxu0  ;;  %v1565_v22 = vmul.f32 %v1561_v15, %v1521_v1 }
 0x851   :  { %v1524_v42 = vpop.f32.mrb[15].mxu1  ;;  %v1566_v43 = vadd.f32 %v1563_v57, %v1562_v46  ;;  %v1572_v19 = vmul.f32 %v1563_v57, %v1563_v57  ;;  %v1573_v21 = vmul.f32 %v1564_v53, %v1564_v53 }
 0x852   :  { %v1574_v20 = vmul.f32 %v1565_v22, %v1565_v22 }
 0x853   :  { %v1575_v23 = vadd.f32 %v1572_v19, %v1571_v6  ;;  %v1567_v32 = vadd.f32 %v1566_v43, %v1564_v53 }
 0x855   :  { %v1576_v29 = vadd.f32 %v1575_v23, %v1573_v21  ;;  %v1568_v34 = vadd.f32 %v1567_v32, %v1565_v22 }
 0x857   :  { %1569 = vadd.xlane.f32.xlu1 %v1568_v34  ;;  %v1577_v58 = vadd.f32 %v1576_v29, %v1574_v20 }
 0x859   :  { %1578 = vadd.xlane.f32.xlu0 %v1577_v58 }
 0x8e4   :  { %v1570_v62 = vpop.xlane.xlu1 %1569 }
 0x8e5   :  { %v1580_v55 = vmul.f32 0.005, %v1570_v62 }
 0x8e6   :  { %v1579_v30 = vpop.xlane.xlu0 %1578 }
 0x8e7   :  { %v1582_v31 = vmul.f32 %v1580_v55, %v1580_v55  ;;  %v1581_v59 = vmul.f32 0.005, %v1579_v30 }
 0x8e9   :  { %v1583_v36 = vsub.f32 %v1581_v59, %v1582_v31 }
 0x8eb   :  { %v1584_v14 = vadd.f32 1e-05, %v1583_v36 }
 0x8ed   :  { %2392 = vrsqrt.f32 %v1584_v14 }
 0x8f7   :  { %v2393_v39 = vpop.eup %2392 }
 0x8f8   :  { %v1586_v60 = vmul.f32 %v3209_v56, %v2393_v39 }
 0x8fa   :  { %1595 = vperm.xlu1 %2365, %v1586_v60   ;;  %v1587_v61 = vmul.f32 %v1586_v60, %v1580_v55 }
 0x8fc   :  { %1589 = vrot.lane.b32.xlu0 %v1587_v61, %s2408_s29 }
 0x8fe   :  { %2366 = vset.pattern.permute.xlu1 %v2414_v44 }
 0x900   :  { %1640 = vrot.lane.b32.xlu0 %v1631_v47, %s2399_s9 }
 0x904   :  { %1692 = vrot.lane.b32.xlu0 %v1631_v47, %s2403_s14 }
 0x96e   :  { %v1590_v7 = vpop.permute.xlu0 %1589 }
 0x96f   :  { %v1592_v10 = vsub.f32 %v3209_v56, %v1590_v7 }
 0x971   :  { %1604 = vperm.xlu1 %2366, %v1592_v10  }
 0x972   :  { %v3274_v51 = vpop.permute.xlu0 %1640 }
 0x975   :  { %1666 = vrot.lane.b32.xlu1 %v1631_v47, %s2401_s13 }
 0x976   :  { %v3278_v43 = vpop.permute.xlu0 %1692 }
 0x979   :  { %1718 = vrot.lane.b32.xlu1 %v1631_v47, %s2405_s16  ;;  %v1596_v37 = vpop.permute.xlu1 %1595 }
 0x97a   :  { %v1598_v38 = vmul.f32 %v1596_v37, %v1478_v24  ;;  %v1599_v3 = vmul.f32 %v1596_v37, %v1480_v28  ;;  %v1600_v48 = vmul.f32 %v1596_v37, %v1519_v11  ;;  %v1601_v27 = vmul.f32 %v1596_v37, %v1521_v1 }
 0x9f0   :  { %v1605_v4 = vpop.permute.xlu1 %1604 }
 0x9f1   :  { %v1607_v40 = vadd.f32 %v1605_v4, %v1598_v38  ;;  %v1608_v8 = vadd.f32 %v1605_v4, %v1599_v3  ;;  %v1609_v2 = vadd.f32 %v1605_v4, %v1600_v48  ;;  %v1610_v49 = vadd.f32 %v1605_v4, %v1601_v27 }
 0x9f3   :  { %v1611_v33 = vmul.f32 0.2, %v1607_v40  ;;  %v1612_v12 = vmul.f32 0.2, %v1608_v8  ;;  %v1613_v35 = vmul.f32 0.2, %v1609_v2 }
 0x9f4   :  { %v1614_v5 = vmul.f32 0.2, %v1610_v49  ;;  %v3272_v6 = vpop.permute.xlu1 %1666 }
 0x9f5   :  { %v1616_v13 = vmax.f32 %v1608_v8, %v1612_v12  ;;  %v1617_v54 = vmax.f32 %v1609_v2, %v1613_v35  ;;  %v1615_v15 = vmax.f32 %v1607_v40, %v1611_v33 }
 0x9f6   :  { %v1618_v24 = vmax.f32 %v1610_v49, %v1614_v5 }
 0x9f7   :  { %v3219_v46 = vpack.c.bf16 %v1616_v13, %v1616_v13  ;;  %v3221_v53 = vpack.c.bf16 %v1617_v54, %v1617_v54  ;;  %v1619_v11 = vpack.c.bf16 %v1615_v15, %v1615_v15 }
 0x9f8   :  { %v3230_v28 = vpack.c.bf16 %v1618_v24, %v1618_v24  ;;  %v3276_v42 = vpop.permute.xlu1 %1718 }
 0x9f9   :  { %1650 = vrot.lane.b32.xlu0 %v3221_v53, %s2400_s10  ;;  %1648 = vrot.lane.b32.xlu1 %v3219_v46, %s2400_s10  ;;  %v1628_v1 = vrot.slane %v3219_v46, 4  ;;  %v1629_v57 = vrot.slane %v3221_v53, 4  ;;  %v1627_v41 = vrot.slane %v1619_v11, 4 }
 0x9fa   :  { %v1630_v17 = vrot.slane %v3230_v28, 4 }
 0x9fd   :  { %1674 = vrot.lane.b32.xlu0 %v3219_v46, %s2402_s0  ;;  %1646 = vrot.lane.b32.xlu1 %v1619_v11, %s2400_s10 }
 0xa01   :  { %1672 = vrot.lane.b32.xlu0 %v1619_v11, %s2402_s0  ;;  %1652 = vrot.lane.b32.xlu1 %v3230_v28, %s2400_s10 }
 0xa05   :  { %1678 = vrot.lane.b32.xlu0 %v3230_v28, %s2402_s0  ;;  %1676 = vrot.lane.b32.xlu1 %v3221_v53, %s2402_s0 }
 0xa09   :  { %1702 = vrot.lane.b32.xlu0 %v3221_v53, %s2404_s15  ;;  %1700 = vrot.lane.b32.xlu1 %v3219_v46, %s2404_s15 }
 0xa0d   :  { %1724 = vrot.lane.b32.xlu0 %v1619_v11, %s2407_s17  ;;  %1698 = vrot.lane.b32.xlu1 %v1619_v11, %s2404_s15 }
 0xa11   :  { %1634 = vrot.lane.b32.xlu0 %v1628_v1, %s2399_s9  ;;  %1704 = vrot.lane.b32.xlu1 %v3230_v28, %s2404_s15 }
 0xa15   :  { %1636 = vrot.lane.b32.xlu1 %v1629_v57, %s2399_s9  ;;  %1632 = vrot.lane.b32.xlu0 %v1627_v41, %s2399_s9 }
 0xa19   :  { %1638 = vrot.lane.b32.xlu1 %v1630_v17, %s2399_s9  ;;  %1662 = vrot.lane.b32.xlu0 %v1629_v57, %s2401_s13 }
 0xa1d   :  { %1660 = vrot.lane.b32.xlu1 %v1628_v1, %s2401_s13  ;;  %1658 = vrot.lane.b32.xlu0 %v1627_v41, %s2401_s13 }
 0xa21   :  { %1688 = vrot.lane.b32.xlu1 %v1629_v57, %s2403_s14  ;;  %1664 = vrot.lane.b32.xlu0 %v1630_v17, %s2401_s13 }
 0xa25   :  { %1684 = vrot.lane.b32.xlu1 %v1627_v41, %s2403_s14  ;;  %1686 = vrot.lane.b32.xlu0 %v1628_v1, %s2403_s14 }
 0xa29   :  { %1690 = vrot.lane.b32.xlu1 %v1630_v17, %s2403_s14  ;;  %1714 = vrot.lane.b32.xlu0 %v1629_v57, %s2405_s16 }
 0xa2d   :  { %1712 = vrot.lane.b32.xlu1 %v1628_v1, %s2405_s16  ;;  %1710 = vrot.lane.b32.xlu0 %v1627_v41, %s2405_s16 }
 0xa31   :  { %1726 = vrot.lane.b32.xlu1 %v3219_v46, %s2407_s17  ;;  %1716 = vrot.lane.b32.xlu0 %v1630_v17, %s2405_s16 }
 0xa35   :  { %1730 = vrot.lane.b32.xlu1 %v3230_v28, %s2407_s17  ;;  %1728 = vrot.lane.b32.xlu0 %v3221_v53, %s2407_s17 }
 0xa6b   :  { %v1649_v19 = vpop.permute.xlu1 %1648  ;;  %v1651_v21 = vpop.permute.xlu0 %1650 }
 0xa6c   :  { %v1655_v4 = vsel %vm90_vm1, %v1649_v19, %v1651_v21 }
 0xa6f   :  { %v1647_v22 = vpop.permute.xlu1 %1646  ;;  %v1675_v23 = vpop.permute.xlu0 %1674 }
 0xa70   :  { %v1654_v27 = vsel %vm90_vm1, %v1647_v22, %v1649_v19 }
 0xa73   :  { %v1653_v32 = vpop.permute.xlu1 %1652  ;;  %v1673_v29 = vpop.permute.xlu0 %1672 }
 0xa74   :  { %v1656_v35 = vsel %vm90_vm1, %v1651_v21, %v1653_v32  ;;  %v1657_v13 = vsel %vm90_vm1, %v1653_v32, %v2716_v50 }
 0xa77   :  { %v1677_v34 = vpop.permute.xlu1 %1676  ;;  %v1679_v20 = vpop.permute.xlu0 %1678 }
 0xa78   :  { %v1682_v22 = vsel %vm125_vm8, %v1677_v34, %v1679_v20  ;;  %v1683_v32 = vsel %vm125_vm8, %v1679_v20, %v2720_v52 }
 0xa7b   :  { %v3280_v58 = vpop.permute.xlu1 %1700  ;;  %v3282_v45 = vpop.permute.xlu0 %1702 }
 0xa7f   :  { %v3284_v62 = vpop.permute.xlu1 %1698  ;;  %v3286_v55 = vpop.permute.xlu0 %1724 }
 0xa80   :  { %v1706_v20 = vsel %vm155_vm7, %v3284_v62, %v3280_v58 }
 0xa83   :  { %v3288_v30 = vpop.permute.xlu1 %1704  ;;  %v1635_v31 = vpop.permute.xlu0 %1634 }
 0xa87   :  { %v1637_v59 = vpop.permute.xlu1 %1636  ;;  %v1633_v36 = vpop.permute.xlu0 %1632 }
 0xa88   :  { %v1643_v14 = vsel %vm70_vm0, %v1635_v31, %v1637_v59  ;;  %v1642_v39 = vsel %vm70_vm0, %v1633_v36, %v1635_v31 }
 0xa89   :  { %v1742_v60 = vsel %vm203_vm4, %v3219_v46, %v1643_v14  ;;  %v1738_v61 = vsel %vm203_vm4, %v1619_v11, %v1642_v39  ;;  %v1680_v11 = vsel %vm125_vm8, %v1673_v29, %v1675_v23 }
 0xa8a   :  { %1817 = vmatprep.subr.bf16.mxu0 %v1742_v60 }
 0xa8b   :  { %v1639_v44 = vpop.permute.xlu1 %1638  ;;  %1818 = vmatpush1.bf16.msra.mxu0 %v1738_v61  ;;  %v1663_v7 = vpop.permute.xlu0 %1662 }
 0xa8c   :  { %v1644_v10 = vsel %vm70_vm0, %v1637_v59, %v1639_v44  ;;  %v1645_v47 = vsel %vm70_vm0, %v1639_v44, %v3274_v51 }
 0xa8d   :  { %v1750_v37 = vsel %vm203_vm4, %v3230_v28, %v1645_v47  ;;  %v1746_v38 = vsel %vm203_vm4, %v3221_v53, %v1644_v10  ;;  %v1681_v28 = vsel %vm125_vm8, %v1675_v23, %v1677_v34  ;;  %v1707_v34 = vsel %vm155_vm7, %v3280_v58, %v3282_v45 }
 0xa8e   :  { %1858 = vmatprep.subr.bf16.mxu1 %v1750_v37  ;;  %v1708_v47 = vsel %vm155_vm7, %v3282_v45, %v3288_v30  ;;  %v1709_v58 = vsel %vm155_vm7, %v3288_v30, %v2879_v26 }
 0xa8f   :  { %v1661_v3 = vpop.permute.xlu1 %1660  ;;  %1859 = vmatpush1.bf16.msra.mxu1 %v1746_v38  ;;  %v1659_v48 = vpop.permute.xlu0 %1658 }
 0xa90   :  { %v1669_v40 = vsel %vm110_vm3, %v1661_v3, %v1663_v7  ;;  %v1668_v8 = vsel %vm110_vm3, %v1659_v48, %v1661_v3 }
 0xa91   :  { %v1758_v2 = vsel %vm203_vm4, %v1655_v4, %v1669_v40  ;;  %v1754_v49 = vsel %vm203_vm4, %v1654_v27, %v1668_v8 }
 0xa92   :  { %1819 = vmatprep.subr.bf16.mxu0 %v1758_v2 }
 0xa93   :  { %v1689_v33 = vpop.permute.xlu1 %1688  ;;  %1820 = vmatpush1.bf16.msra.mxu0 %v1754_v49  ;;  %v1665_v12 = vpop.permute.xlu0 %1664  ;;  %v1901_v49 = vsub.s32 3, %v2618_v0 }
 0xa94   :  { %v1670_v54 = vsel %vm110_vm3, %v1663_v7, %v1665_v12  ;;  %v1671_v5 = vsel %vm110_vm3, %v1665_v12, %v3272_v6 }
 0xa95   :  { %v1766_v15 = vsel %vm203_vm4, %v1657_v13, %v1671_v5  ;;  %v1762_v46 = vsel %vm203_vm4, %v1656_v35, %v1670_v54  ;;  %v1902_v12 = vrot.slane %v3068_v18, %v1901_v49  ;;  %v1910_v13 = vrot.slane %v3075_v16, %v1901_v49 }
 0xa96   :  { %1860 = vmatprep.subr.bf16.mxu1 %v1766_v15 }
 0xa97   :  { %v1685_v53 = vpop.permute.xlu1 %1684  ;;  %1861 = vmatpush1.bf16.msra.mxu1 %v1762_v46  ;;  %v1687_v24 = vpop.permute.xlu0 %1686  ;;  %v1922_v5 = vrot.slane %v1902_v12, %v1901_v49  ;;  %v1930_v46 = vrot.slane %v1910_v13, %v1901_v49 }
 0xa98   :  { %v1694_v1 = vsel %vm140_vm6, %v1685_v53, %v1687_v24  ;;  %v1695_v57 = vsel %vm140_vm6, %v1687_v24, %v1689_v33 }
 0xa99   :  { %v1774_v41 = vsel %vm203_vm4, %v1681_v28, %v1695_v57  ;;  %v1770_v17 = vsel %vm203_vm4, %v1680_v11, %v1694_v1 }
 0xa9a   :  { %1821 = vmatprep.subr.bf16.mxu0 %v1774_v41 }
 0xa9b   :  { %v1691_v19 = vpop.permute.xlu1 %1690  ;;  %1822 = vmatpush1.bf16.msra.mxu0 %v1770_v17  ;;  %v1715_v21 = vpop.permute.xlu0 %1714 }
 0xa9c   :  { %v1696_v29 = vsel %vm140_vm6, %v1689_v33, %v1691_v19  ;;  %v1697_v23 = vsel %vm140_vm6, %v1691_v19, %v3278_v43  ;;  %v1905_v33 = vsub.s32 7, %v2618_v0 }
 0xa9d   :  { %v1782_v31 = vsel %vm203_vm4, %v1683_v32, %v1697_v23  ;;  %v1778_v59 = vsel %vm203_vm4, %v1682_v22, %v1696_v29 }
 0xa9e   :  { %1862 = vmatprep.subr.bf16.mxu1 %v1782_v31  ;;  %v1906_v35 = vrot.slane %v3068_v18, %v1905_v33  ;;  %v1914_v54 = vrot.slane %v3075_v16, %v1905_v33 }
 0xa9f   :  { %v1713_v36 = vpop.permute.xlu1 %1712  ;;  %1863 = vmatpush1.bf16.msra.mxu1 %v1778_v59  ;;  %v1711_v14 = vpop.permute.xlu0 %1710 }
 0xaa0   :  { %v1721_v39 = vsel %vm170_vm9, %v1713_v36, %v1715_v21  ;;  %v1720_v60 = vsel %vm170_vm9, %v1711_v14, %v1713_v36  ;;  %v1926_v15 = vrot.slane %v1906_v35, %v1901_v49  ;;  %v1934_v24 = vrot.slane %v1914_v54, %v1901_v49 }
 0xaa1   :  { %v1790_v61 = vsel %vm203_vm4, %v1707_v34, %v1721_v39  ;;  %v1786_v44 = vsel %vm203_vm4, %v1706_v20, %v1720_v60  ;;  %v2415_v39 = vmov 6  }
 0xaa2   :  { %1823 = vmatprep.subr.bf16.mxu0 %v1790_v61  ;;  %2367 = vset.pattern.permute.xlu1 %v2415_v39 }
 0xaa3   :  { %v1727_v7 = vpop.permute.xlu1 %1726  ;;  %1824 = vmatpush1.bf16.msra.mxu0 %v1786_v44  ;;  %v1717_v10 = vpop.permute.xlu0 %1716 }
 0xaa4   :  { %v1722_v62 = vsel %vm170_vm9, %v1715_v21, %v1717_v10  ;;  %v1723_v37 = vsel %vm170_vm9, %v1717_v10, %v3276_v42  ;;  %v1732_v48 = vsel %vm185_vm10, %v3286_v55, %v1727_v7  ;;  %v1800_v55 = vld [vmem:[%s3513_s4] sm:$0xf] }
 0xaa5   :  { %v1798_v38 = vsel %vm203_vm4, %v1709_v58, %v1723_v37  ;;  %v1794_v3 = vsel %vm203_vm4, %v1708_v47, %v1722_v62  ;;  %v1806_v8 = vsel %vm203_vm4, %v1732_v48, 0  ;;  %v2416_v62 = vmov 7  }
 0xaa6   :  { %1864 = vmatprep.subr.bf16.mxu1 %v1798_v38  ;;  %2368 = vset.pattern.permute.xlu0 %v2416_v62 }
 0xaa7   :  { %v1731_v4 = vpop.permute.xlu1 %1730  ;;  %1865 = vmatpush1.bf16.msra.mxu1 %v1794_v3  ;;  %v1729_v45 = vpop.permute.xlu0 %1728 }
 0xaa8   :  { %v1735_v27 = vsel %vm185_vm10, %v1731_v4, %v3049_v9  ;;  %v1733_v30 = vsel %vm185_vm10, %v1727_v7, %v1729_v45  ;;  %v1734_v40 = vsel %vm185_vm10, %v1729_v45, %v1731_v4 }
 0xaa9   :  { %v1812_v2 = vsel %vm203_vm4, %v1734_v40, 0  ;;  %2322 = vmatprep.subr.msk.bf16.mxu0 %vm203_vm4, %v1733_v30  ;;  %2324 = vmatprep.subr.msk.bf16.mxu1 %vm203_vm4, %v1735_v27 }
 0xaaa   :  { %1826 = vmatpush1.bf16.msra.mxu0 %v1806_v8 }
 0xaab   :  { %1867 = vmatpush1.bf16.msra.mxu1 %v1812_v2 }
 0xaad   :  { %2323 = vmatmul.mubr.msk.bf16.vlgmr.msra.gmra.mrb[16].mxu0 %vm1801_vm14, %v1800_v55 }
 0xaae   :  { %2325 = vmatmul.mubr.msk.bf16.vlgmr.msra.gmra.mrb[16].mxu1 %vm1801_vm14, %v1800_v55  ;;  %2217 = vmatprep.mubr.bf16.mxu0 %v2406_v25 }
 0xaaf   :  { %2258 = vmatprep.mubr.bf16.mxu1 %v2406_v25 }
 0xb80   :  { %v1851_v53 = vpop.f32.mrb[16].mxu0 }
 0xb81   :  { %v1935_v11 = vmul.f32 %v1922_v5, %v1851_v53  ;;  %v1853_v28 = vpop.f32.mrb[17].mxu0  ;;  %v1892_v25 = vpop.f32.mrb[16].mxu1 }
 0xb82   :  { %v1936_v1 = vmul.f32 %v1926_v15, %v1853_v28  ;;  %v1855_v57 = vpop.f32.mrb[18].mxu0  ;;  %v1937_v41 = vmul.f32 %v1930_v46, %v1892_v25  ;;  %v1894_v17 = vpop.f32.mrb[17].mxu1 }
 0xb83   :  { %v1944_v19 = vmul.f32 %v1935_v11, %v1935_v11  ;;  %v1856_v21 = vpop.f32.mrb[19].mxu0  ;;  %v1896_v22 = vpop.f32.mrb[18].mxu1  ;;  %v1938_v23 = vmul.f32 %v1934_v24, %v1894_v17 }
 0xb84   :  { %v1939_v18 = vadd.f32 %v1936_v1, %v1935_v11  ;;  %v1945_v32 = vmul.f32 %v1936_v1, %v1936_v1  ;;  %v1946_v29 = vmul.f32 %v1937_v41, %v1937_v41  ;;  %v1897_v16 = vpop.f32.mrb[19].mxu1  ;;  %v2417_v21 = vmov 8  }
 0xb85   :  { %v1947_v34 = vmul.f32 %v1938_v23, %v1938_v23 }
 0xb86   :  { %v1948_v31 = vadd.f32 %v1945_v32, %v1944_v19  ;;  %v1940_v59 = vadd.f32 %v1939_v18, %v1937_v41 }
 0xb88   :  { %v1949_v36 = vadd.f32 %v1948_v31, %v1946_v29  ;;  %v1941_v14 = vadd.f32 %v1940_v59, %v1938_v23 }
 0xb8a   :  { %1942 = vadd.xlane.f32.xlu0 %v1941_v14  ;;  %v1950_v20 = vadd.f32 %v1949_v36, %v1947_v34 }
 0xb8c   :  { %1951 = vadd.xlane.f32.xlu1 %v1950_v20 }
 0xc17   :  { %v1943_v60 = vpop.xlane.xlu0 %1942 }
 0xc18   :  { %v1953_v61 = vmul.f32 0.0078125, %v1943_v60 }
 0xc19   :  { %v1952_v44 = vpop.xlane.xlu1 %1951 }
 0xc1a   :  { %v1955_v7 = vmul.f32 %v1953_v61, %v1953_v61  ;;  %v1954_v10 = vmul.f32 0.0078125, %v1952_v44 }
 0xc1c   :  { %v1956_v47 = vsub.f32 %v1954_v10, %v1955_v7 }
 0xc1e   :  { %v1957_v58 = vadd.f32 1e-05, %v1956_v47 }
 0xc20   :  { %2394 = vrsqrt.f32 %v1957_v58 }
 0xc2a   :  { %v2395_v37 = vpop.eup %2394 }
 0xc2b   :  { %v1959_v38 = vmul.f32 %v3209_v56, %v2395_v37 }
 0xc2d   :  { %1968 = vperm.xlu1 %2367, %v1959_v38   ;;  %v1960_v3 = vmul.f32 %v1959_v38, %v1953_v61 }
 0xc2f   :  { %1962 = vrot.lane.b32.xlu0 %v1960_v3, %s2408_s29 }
 0xca1   :  { %v1963_v48 = vpop.permute.xlu0 %1962 }
 0xca2   :  { %v1965_v4 = vsub.f32 %v3209_v56, %v1963_v48 }
 0xca4   :  { %1977 = vperm.xlu0 %2368, %v1965_v4  }
 0xca8   :  { %2369 = vset.pattern.permute.xlu0 %v2417_v21 }
 0xcac   :  { %v1969_v45 = vpop.permute.xlu1 %1968 }
 0xcad   :  { %v1972_v27 = vmul.f32 %v1969_v45, %v1853_v28  ;;  %v1973_v30 = vmul.f32 %v1969_v45, %v1892_v25  ;;  %v1974_v40 = vmul.f32 %v1969_v45, %v1894_v17  ;;  %v1971_v2 = vmul.f32 %v1969_v45, %v1851_v53 }
 0xd23   :  { %v1978_v8 = vpop.permute.xlu0 %1977 }
 0xd24   :  { %v1981_v55 = vadd.f32 %v1978_v8, %v1972_v27  ;;  %v1982_v49 = vadd.f32 %v1978_v8, %v1973_v30  ;;  %v1983_v33 = vadd.f32 %v1978_v8, %v1974_v40  ;;  %v1980_v12 = vadd.f32 %v1978_v8, %v1971_v2 }
 0xd26   :  { %v1985_v35 = vmul.f32 0.2, %v1981_v55  ;;  %v1986_v13 = vmul.f32 0.2, %v1982_v49  ;;  %v1987_v54 = vmul.f32 0.2, %v1983_v33 }
 0xd27   :  { %v1984_v46 = vmul.f32 0.2, %v1980_v12 }
 0xd28   :  { %v1989_v5 = vmax.f32 %v1981_v55, %v1985_v35  ;;  %v1990_v15 = vmax.f32 %v1982_v49, %v1986_v13  ;;  %v1991_v24 = vmax.f32 %v1983_v33, %v1987_v54 }
 0xd29   :  { %v1988_v53 = vmax.f32 %v1980_v12, %v1984_v46 }
 0xd2a   :  { %v1993_v11 = vpack.c.bf16 %v1989_v5, %v1989_v5  ;;  %v3377_v1 = vpack.c.bf16 %v1990_v15, %v1990_v15  ;;  %v3382_v28 = vpack.c.bf16 %v1991_v24, %v1991_v24 }
 0xd2b   :  { %v1992_v25 = vpack.c.bf16 %v1988_v53, %v1988_v53 }
 0xd2c   :  { %2020 = vrot.lane.b32.xlu1 %v3377_v1, %s2400_s10  ;;  %2018 = vrot.lane.b32.xlu0 %v1993_v11, %s2400_s10  ;;  %v2001_v57 = vrot.slane %v1993_v11, 4  ;;  %v2002_v41 = vrot.slane %v3377_v1, 4  ;;  %v2003_v19 = vrot.slane %v3382_v28, 4 }
 0xd2d   :  { %v2000_v17 = vrot.slane %v1992_v25, 4 }
 0xd30   :  { %2044 = vrot.lane.b32.xlu1 %v3377_v1, %s2402_s0  ;;  %2022 = vrot.lane.b32.xlu0 %v3382_v28, %s2400_s10 }
 0xd34   :  { %2068 = vrot.lane.b32.xlu1 %v3377_v1, %s2404_s15  ;;  %2016 = vrot.lane.b32.xlu0 %v1992_v25, %s2400_s10 }
 0xd38   :  { %2006 = vrot.lane.b32.xlu1 %v2001_v57, %s2399_s9  ;;  %2042 = vrot.lane.b32.xlu0 %v1993_v11, %s2402_s0 }
 0xd3c   :  { %2008 = vrot.lane.b32.xlu1 %v2002_v41, %s2399_s9  ;;  %2046 = vrot.lane.b32.xlu0 %v3382_v28, %s2402_s0 }
 0xd40   :  { %2040 = vrot.lane.b32.xlu0 %v1992_v25, %s2402_s0  ;;  %2004 = vrot.lane.b32.xlu1 %v2000_v17, %s2399_s9 }
 0xd44   :  { %2066 = vrot.lane.b32.xlu0 %v1993_v11, %s2404_s15  ;;  %2030 = vrot.lane.b32.xlu1 %v2001_v57, %s2401_s13 }
 0xd48   :  { %2070 = vrot.lane.b32.xlu0 %v3382_v28, %s2404_s15  ;;  %2034 = vrot.lane.b32.xlu1 %v2003_v19, %s2401_s13 }
 0xd4c   :  { %2064 = vrot.lane.b32.xlu0 %v1992_v25, %s2404_s15  ;;  %2028 = vrot.lane.b32.xlu1 %v2000_v17, %s2401_s13 }
 0xd50   :  { %2010 = vrot.lane.b32.xlu0 %v2003_v19, %s2399_s9  ;;  %2054 = vrot.lane.b32.xlu1 %v2001_v57, %s2403_s14 }
 0xd54   :  { %2032 = vrot.lane.b32.xlu0 %v2002_v41, %s2401_s13  ;;  %2058 = vrot.lane.b32.xlu1 %v2003_v19, %s2403_s14 }
 0xd58   :  { %2056 = vrot.lane.b32.xlu0 %v2002_v41, %s2403_s14  ;;  %2052 = vrot.lane.b32.xlu1 %v2000_v17, %s2403_s14 }
 0xd5c   :  { %2080 = vrot.lane.b32.xlu0 %v2002_v41, %s2405_s16  ;;  %2078 = vrot.lane.b32.xlu1 %v2001_v57, %s2405_s16 }
 0xd60   :  { %2088 = vrot.lane.b32.xlu0 %v1992_v25, %s2407_s17  ;;  %2090 = vrot.lane.b32.xlu1 %v1993_v11, %s2407_s17 }
 0xd64   :  { %2092 = vrot.lane.b32.xlu0 %v3377_v1, %s2407_s17  ;;  %2082 = vrot.lane.b32.xlu1 %v2003_v19, %s2405_s16 }
 0xd68   :  { %2076 = vrot.lane.b32.xlu1 %v2000_v17, %s2405_s16  ;;  %2167 = vperm.xlu0 %2369, %v3209_v56  }
 0xd6c   :  { %2094 = vrot.lane.b32.xlu1 %v3382_v28, %s2407_s17 }
 0xd9e   :  { %v2021_v22 = vpop.permute.xlu1 %2020  ;;  %v2019_v18 = vpop.permute.xlu0 %2018 }
 0xd9f   :  { %v2025_v40 = vsel %vm90_vm1, %v2019_v18, %v2021_v22 }
 0xda2   :  { %v2045_v32 = vpop.permute.xlu1 %2044  ;;  %v2023_v29 = vpop.permute.xlu0 %2022 }
 0xda3   :  { %v2027_v30 = vsel %vm90_vm1, %v2023_v29, %v2716_v50 }
 0xda6   :  { %v3424_v23 = vpop.permute.xlu1 %2068  ;;  %v2017_v16 = vpop.permute.xlu0 %2016 }
 0xda7   :  { %v2024_v50 = vsel %vm90_vm1, %v2017_v16, %v2019_v18 }
 0xdaa   :  { %v2007_v31 = vpop.permute.xlu1 %2006  ;;  %v2043_v59 = vpop.permute.xlu0 %2042 }
 0xdab   :  { %v2049_v15 = vsel %vm125_vm8, %v2043_v59, %v2045_v32 }
 0xdae   :  { %v2009_v36 = vpop.permute.xlu1 %2008  ;;  %v2047_v14 = vpop.permute.xlu0 %2046 }
 0xdaf   :  { %v2013_v34 = vsel %vm70_vm0, %v2007_v31, %v2009_v36  ;;  %v2051_v54 = vsel %vm125_vm8, %v2047_v14, %v2720_v52  ;;  %v2050_v46 = vsel %vm125_vm8, %v2045_v32, %v2047_v14 }
 0xdb0   :  { %v2106_v20 = vsel %vm203_vm4, %v1993_v11, %v2013_v34 }
 0xdb1   :  { %2185 = vmatprep.subr.bf16.mxu0 %v2106_v20 }
 0xdb2   :  { %v2041_v56 = vpop.permute.xlu0 %2040  ;;  %v2005_v39 = vpop.permute.xlu1 %2004 }
 0xdb3   :  { %v2012_v60 = vsel %vm70_vm0, %v2005_v39, %v2007_v31 }
 0xdb4   :  { %v2102_v61 = vsel %vm203_vm4, %v1992_v25, %v2012_v60 }
 0xdb5   :  { %2186 = vmatpush1.bf16.msra.mxu0 %v2102_v61 }
 0xdb6   :  { %v3430_v44 = vpop.permute.xlu0 %2066  ;;  %v2031_v7 = vpop.permute.xlu1 %2030 }
 0xdb7   :  { %v2073_v21 = vsel %vm155_vm7, %v3430_v44, %v3424_v23 }
 0xdba   :  { %v2071_v10 = vpop.permute.xlu0 %2070  ;;  %v2035_v47 = vpop.permute.xlu1 %2034 }
 0xdbb   :  { %v2039_v3 = vsel %vm110_vm3, %v2035_v47, %v3272_v6  ;;  %v2074_v31 = vsel %vm155_vm7, %v3424_v23, %v2071_v10 }
 0xdbc   :  { %v2130_v55 = vsel %vm203_vm4, %v2027_v30, %v2039_v3 }
 0xdbe   :  { %v3432_v58 = vpop.permute.xlu0 %2064  ;;  %v2029_v62 = vpop.permute.xlu1 %2028 }
 0xdbf   :  { %v2036_v8 = vsel %vm110_vm3, %v2029_v62, %v2031_v7  ;;  %v2072_v23 = vsel %vm155_vm7, %v3432_v58, %v3430_v44  ;;  %v2164_v58 = vld [vmem:[%s3514_s5] sm:$0x1] }
 0xdc0   :  { %v2118_v5 = vsel %vm203_vm4, %v2024_v50, %v2036_v8 }
 0xdc2   :  { %v2011_v37 = vpop.permute.xlu0 %2010  ;;  %v2055_v38 = vpop.permute.xlu1 %2054 }
 0xdc3   :  { %v2014_v48 = vsel %vm70_vm0, %v2009_v36, %v2011_v37  ;;  %v2015_v4 = vsel %vm70_vm0, %v2011_v37, %v3274_v51  ;;  %v2026_v51 = vsel %vm90_vm1, %v2021_v22, %v2023_v29  ;;  %v2418_v37 = vmov 1966171168  }
 0xdc4   :  { %v2114_v45 = vsel %vm203_vm4, %v3382_v28, %v2015_v4  ;;  %v2110_v27 = vsel %vm203_vm4, %v3377_v1, %v2014_v48  ;;  %v2048_v1 = vsel %vm125_vm8, %v2041_v56, %v2043_v59  ;;  %v2075_v59 = vsel %vm155_vm7, %v2071_v10, %v2879_v26 }
 0xdc5   :  { %2226 = vmatprep.subr.bf16.mxu1 %v2114_v45 }
 0xdc6   :  { %2227 = vmatpush1.bf16.msra.mxu1 %v2110_v27  ;;  %v2033_v6 = vpop.permute.xlu0 %2032  ;;  %v2059_v2 = vpop.permute.xlu1 %2058 }
 0xdc7   :  { %v2037_v49 = vsel %vm110_vm3, %v2031_v7, %v2033_v6  ;;  %v2038_v33 = vsel %vm110_vm3, %v2033_v6, %v2035_v47  ;;  %v2063_v12 = vsel %vm140_vm6, %v2059_v2, %v3278_v43  ;;  %2228 = vmatprep.subr.bf16.mxu1 %v2130_v55 }
 0xdc8   :  { %v2122_v35 = vsel %vm203_vm4, %v2025_v40, %v2037_v49  ;;  %v2126_v13 = vsel %vm203_vm4, %v2026_v51, %v2038_v33  ;;  %v2146_v11 = vsel %vm203_vm4, %v2051_v54, %v2063_v12 }
 0xdc9   :  { %2187 = vmatprep.subr.bf16.mxu0 %v2122_v35 }
 0xdca   :  { %v2057_v24 = vpop.permute.xlu0 %2056  ;;  %2188 = vmatpush1.bf16.msra.mxu0 %v2118_v5  ;;  %2229 = vmatpush1.bf16.msra.mxu1 %v2126_v13  ;;  %v2053_v43 = vpop.permute.xlu1 %2052 }
 0xdcb   :  { %v2061_v53 = vsel %vm140_vm6, %v2055_v38, %v2057_v24  ;;  %v2062_v28 = vsel %vm140_vm6, %v2057_v24, %v2059_v2  ;;  %v2060_v52 = vsel %vm140_vm6, %v2053_v43, %v2055_v38  ;;  %2230 = vmatprep.subr.bf16.mxu1 %v2146_v11  ;;  %v2274_v38 = vunpack.c.l.s4 %v2418_v37 }
 0xdcc   :  { %v2138_v25 = vsel %vm203_vm4, %v2049_v15, %v2061_v53  ;;  %v2134_v57 = vsel %vm203_vm4, %v2048_v1, %v2060_v52  ;;  %v2142_v41 = vsel %vm203_vm4, %v2050_v46, %v2062_v28 }
 0xdcd   :  { %2189 = vmatprep.subr.bf16.mxu0 %v2138_v25  ;;  %v2275_v3 = vunpack.c.0.s8 %v2274_v38 }
 0xdce   :  { %v2081_v17 = vpop.permute.xlu0 %2080  ;;  %2190 = vmatpush1.bf16.msra.mxu0 %v2134_v57  ;;  %2231 = vmatpush1.bf16.msra.mxu1 %v2142_v41  ;;  %v2079_v19 = vpop.permute.xlu1 %2078 }
 0xdcf   :  { %v2085_v22 = vsel %vm170_vm9, %v2079_v19, %v2081_v17  ;;  %v2278_v2 = vsub.s32 %v2275_v3, %v2618_v0 }
 0xdd0   :  { %v2154_v18 = vsel %vm203_vm4, %v2073_v21, %v2085_v22 }
 0xdd1   :  { %2191 = vmatprep.subr.bf16.mxu0 %v2154_v18 }
 0xdd2   :  { %v2091_v32 = vpop.permute.xlu1 %2090  ;;  %v2089_v29 = vpop.permute.xlu0 %2088 }
 0xdd3   :  { %v2096_v61 = vsel %vm185_vm10, %v2089_v29, %v2091_v32 }
 0xdd4   :  { %v2174_v62 = vsel %vm203_vm4, %v2096_v61, 0 }
 0xdd6   :  { %v2083_v16 = vpop.permute.xlu1 %2082  ;;  %v2093_v56 = vpop.permute.xlu0 %2092 }
 0xdd7   :  { %v2086_v36 = vsel %vm170_vm9, %v2081_v17, %v2083_v16  ;;  %v2087_v14 = vsel %vm170_vm9, %v2083_v16, %v3276_v42  ;;  %v2097_v42 = vsel %vm185_vm10, %v2091_v32, %v2093_v56 }
 0xdd8   :  { %v2162_v34 = vsel %vm203_vm4, %v2075_v59, %v2087_v14  ;;  %v2158_v20 = vsel %vm203_vm4, %v2074_v31, %v2086_v36 }
 0xdd9   :  { %2232 = vmatprep.subr.bf16.mxu1 %v2162_v34 }
 0xdda   :  { %2233 = vmatpush1.bf16.msra.mxu1 %v2158_v20  ;;  %v2077_v39 = vpop.permute.xlu1 %2076 }
 0xddb   :  { %v2084_v60 = vsel %vm170_vm9, %v2077_v39, %v2079_v19 }
 0xddc   :  { %v2150_v26 = vsel %vm203_vm4, %v2072_v23, %v2084_v60 }
 0xddd   :  { %2192 = vmatpush1.bf16.msra.mxu0 %v2150_v26 }
 0xdde   :  { %2326 = vmatprep.subr.msk.bf16.mxu0 %vm203_vm4, %v2097_v42  ;;  %v2095_v7 = vpop.permute.xlu1 %2094 }
 0xddf   :  { %v2098_v10 = vsel %vm185_vm10, %v2093_v56, %v2095_v7  ;;  %v2099_v47 = vsel %vm185_vm10, %v2095_v7, %v3049_v9 }
 0xde0   :  { %v2180_v44 = vsel %vm203_vm4, %v2098_v10, 0  ;;  %2328 = vmatprep.subr.msk.bf16.mxu1 %vm203_vm4, %v2099_v47 }
 0xde1   :  { %2194 = vmatpush1.bf16.msra.mxu0 %v2174_v62  ;;  %2235 = vmatpush1.bf16.msra.mxu1 %v2180_v44 }
 0xde4   :  { %2327 = vmatmul.mubr.msk.bf16.vlgmr.msra.gmra.mrb[20].mxu0 %vm1801_vm14, %v2164_v58  ;;  %2329 = vmatmul.mubr.msk.bf16.vlgmr.msra.gmra.mrb[20].mxu1 %vm1801_vm14, %v2164_v58 }
 0xde7   :  { %v2168_v9 = vpop.permute.xlu0 %2167 }
 0xeb7   :  { %v2219_v48 = vpop.f32.mrb[20].mxu0  ;;  %v2260_v4 = vpop.f32.mrb[20].mxu1 }
 0xeb8   :  { %v2221_v45 = vpop.f32.mrb[21].mxu0  ;;  %v2262_v27 = vpop.f32.mrb[21].mxu1  ;;  %v2220_v30 = vadd.f32 %v2219_v48, %v2168_v9  ;;  %v2261_v40 = vadd.f32 %v2260_v4, %v2168_v9 }
 0xeb9   :  { %v2223_v8 = vpop.f32.mrb[22].mxu0  ;;  %v2264_v6 = vpop.f32.mrb[22].mxu1  ;;  %v2222_v55 = vadd.f32 %v2221_v45, %v2168_v9  ;;  %v2263_v51 = vadd.f32 %v2262_v27, %v2168_v9 }
 0xeba   :  { %v2224_v49 = vpop.f32.mrb[23].mxu0  ;;  %v2265_v33 = vpop.f32.mrb[23].mxu1 }
 0xebb   :  { %v2271_v12 = vcombine.low %v2220_v30, %v2222_v55  ;;  %v2272_v50 = vcombine.low %v2261_v40, %v2263_v51 }
 0xebd   :  { %v2279_v35 = vrot.slane %v2271_v12, %v2278_v2  ;;  %v2286_v13 = vrot.slane %v2272_v50, %v2278_v2 }
 0xebf   :  { %v2287_v54 = vcombine.low %v2279_v35, %v2286_v13 }
 0xec1   :  { %v2294_v5 = vrot.slane %v2287_v54, %v2278_v2 }
 0xec3   :  { %2300 = vst.msk [vmem:[%s3515_s8] sm:$0xf] %vm2298_vm15, %v2294_v5 }

</bundles_post_ra>
